<compile_context>
chip_gen: v7x
topology: tpu7x:2x2x1
jax: 0.10.0
libtpu: 0.0.40
codegen_flags: <defaults>
</compile_context>

<pallas_src>
import functools

import jax
import jax.numpy as jnp
from jax.experimental import pallas as pl
from jax.experimental.pallas import tpu as pltpu


def _round_up(x, m):
    return -(-x // m) * m


# ----------------------------------------------------------------------------
# Pallas kernel: full `computer()` pipeline for one tile of rows.
#   x  : (TILE, EC)            raw concat [server, client_0, ..., client_{C-2}]
#   a  = x @ W1 + b1           W1 block-structured -> a = [dnn | dec_0 | ...]
#   ag = a @ [W_agg|W_g1] + b  -> agg = ag[:, :E], h1 = ag[:, E:]
#   h  = softmax((h1 @ Wg2 + b) @ Wg3 + b)   gate over clients (dim=1)
#   out= 0.5*agg + 0.5*sum_i a[:, iE:(i+1)E] * gate[:, i]
# ----------------------------------------------------------------------------
def _computer_kernel(x_ref, w1_ref, w2_ref, wg2_ref, wg3_ref, b_ref, o_ref,
                     *, embed_size, client_count, out_width):
    E, C = embed_size, client_count
    EC = E * C
    cd = w1_ref.dtype          # matmul-input dtype (f32 or bf16); accum is f32

    x = x_ref[...]

    # ---- fused DNN + per-client decoders: one (tile,EC)@(EC,EC) matmul ----
    a = (jnp.dot(x, w1_ref[...], preferred_element_type=jnp.float32)
         + b_ref[0:1, :EC])                                     # (tile, EC) f32

    # ---- fused Aggregation + first gate layer: a @ [W_agg | W_g1] ----
    ag = (jnp.dot(a.astype(cd), w2_ref[...],
                  preferred_element_type=jnp.float32)
          + b_ref[1:2, :E + 2 * EC])                            # (tile, E+2EC)
    agg = ag[:, :E]                                             # (tile, E)
    h = ag[:, E:]                                               # (tile, 2EC)

    # ---- remaining gate layers + softmax over the client axis (f32) ----
    h = (jnp.dot(h.astype(cd), wg2_ref[...],
                 preferred_element_type=jnp.float32) + b_ref[2:3, :EC])
    h = (jnp.dot(h.astype(cd), wg3_ref[...],
                 preferred_element_type=jnp.float32) + b_ref[3:4, :C])
    h = h - jnp.max(h, axis=-1, keepdims=True)
    eh = jnp.exp(h)
    gate = eh * pl.reciprocal(jnp.sum(eh, axis=-1, keepdims=True), approx=True)

    # ---- gated mixture of the per-client embeddings ----
    mix = a[:, :E] * gate[:, 0:1]
    for i in range(1, C):
        mix = mix + a[:, i * E:(i + 1) * E] * gate[:, i:i + 1]

    out = 0.5 * agg + 0.5 * mix                                 # (tile, E)

    # lane-dense store: pad to a multiple of 128 lanes, unmasked full-block vst
    pad = out_width - E
    if pad:
        out = jnp.concatenate(
            [out, jnp.zeros((out.shape[0], pad), out.dtype)], axis=-1)
    o_ref[...] = out.astype(o_ref.dtype)


# ----------------------------------------------------------------------------
# Weight packing (done once per forward in plain JAX)
# ----------------------------------------------------------------------------
def pack_params(params, *, embed_size, client_count, matmul_dtype=jnp.float32):
    E, C = embed_size, client_count
    EC = E * C

    # block-structured fused DNN + decoder weight: cols[0:E] = W_dnn (all rows),
    # cols[iE:(i+1)E] = W_dec[i-1] on rows [iE:(i+1)E], zeros elsewhere.
    w1 = jnp.zeros((EC, EC), jnp.float32)
    w1 = w1.at[:, :E].set(params["w_dnn"])
    for i in range(C - 1):
        w1 = w1.at[(i + 1) * E:(i + 2) * E,
                   (i + 1) * E:(i + 2) * E].set(params["w_dec"][i])
    b1 = jnp.concatenate(
        [params["b_dnn"]] + [params["b_dec"][i] for i in range(C - 1)],
        axis=-1)                                               # (1, EC)

    # fused Aggregation + gate layer 1
    w2 = jnp.concatenate([params["w_agg"], params["w_g1"]], axis=-1)  # (EC, E+2EC)
    b2 = jnp.concatenate([params["b_agg"], params["b_g1"]], axis=-1)  # (1, E+2EC)

    wg2, bg2 = params["w_g2"], params["b_g2"]
    wg3, bg3 = params["w_g3"], params["b_g3"]

    bw = E + 2 * EC                      # widest bias segment

    def _row(b):
        return jnp.pad(b, ((0, 0), (0, bw - b.shape[-1])))

    bias = jnp.concatenate([_row(b1), _row(b2), _row(bg2), _row(bg3)],
                           axis=0)                              # (4, bw)

    return {
        "w1": w1.astype(matmul_dtype),
        "w2": w2.astype(matmul_dtype),
        "wg2": wg2.astype(matmul_dtype),
        "wg3": wg3.astype(matmul_dtype),
        "bias": bias.astype(jnp.float32),   # biases stay f32 (added to f32 acc)
    }


# ----------------------------------------------------------------------------
# pallas_call wrapper
# ----------------------------------------------------------------------------
def computer_pallas(x_concat, packed, *, embed_size, client_count, tile=128):
    """Run the computer() pipeline on an [N, E*C] concat table (any N)."""
    N, EC = x_concat.shape
    E, C = embed_size, client_count
    assert EC == E * C

    n_pad = _round_up(N, tile)
    if n_pad != N:
        x_concat = jnp.pad(x_concat, ((0, n_pad - N), (0, 0)))

    out_width = _round_up(E, 128)        # lane-dense output width

    kernel = functools.partial(_computer_kernel,
                               embed_size=E, client_count=C,
                               out_width=out_width)

    w1, w2, wg2, wg3, bslab = (packed["w1"], packed["w2"], packed["wg2"],
                               packed["wg3"], packed["bias"])

    const = lambda i: (0, 0)
    in_specs = [
        pl.BlockSpec((tile, EC), lambda i: (i, 0)),   # x rows tiled over grid
        pl.BlockSpec(w1.shape, const),                # fused DNN+decoders
        pl.BlockSpec(w2.shape, const),                # [W_agg | W_g1]
        pl.BlockSpec(wg2.shape, const),               # gate layer 2
        pl.BlockSpec(wg3.shape, const),               # gate layer 3
        pl.BlockSpec(bslab.shape, const),             # packed bias slab
    ]

    out = pl.pallas_call(
        kernel,
        out_shape=jax.ShapeDtypeStruct((n_pad, out_width), jnp.float32),
        grid_spec=pltpu.PrefetchScalarGridSpec(
            num_scalar_prefetch=0,
            grid=(n_pad // tile,),
            in_specs=in_specs,
            out_specs=pl.BlockSpec((tile, out_width), lambda i: (i, 0)),
        ),
        compiler_params=pltpu.CompilerParams(
            dimension_semantics=("parallel",)),
    )(x_concat.astype(w1.dtype), w1, w2, wg2, wg3, bslab)

    return out[:N, :E]


# ----------------------------------------------------------------------------
# Model wrapper (glue in plain JAX: concatenation, gathers, BPR scores)
# ----------------------------------------------------------------------------
def init_params(key, user_count, item_count, embed_size, client_count):
    E, C = embed_size, client_count
    ks = jax.random.split(key, 16)
    s = 0.05
    return {
        # embedding tables: server + (C-1) clients
        "embed_user": jax.random.normal(ks[0], (C, user_count, E), jnp.float32) * s,
        "embed_item": jax.random.normal(ks[1], (C, item_count, E), jnp.float32) * s,
        # DNN (MLP [E*C -> E])
        "w_dnn": jax.random.normal(ks[2], (E * C, E), jnp.float32) * s,
        "b_dnn": jax.random.normal(ks[3], (1, E), jnp.float32) * s,
        # decoders (C-1 MLPs [E -> E])
        "w_dec": jax.random.normal(ks[4], (C - 1, E, E), jnp.float32) * s,
        "b_dec": jax.random.normal(ks[5], (C - 1, 1, E), jnp.float32) * s,
        # Aggregation (MLP [E*C -> E])
        "w_agg": jax.random.normal(ks[6], (E * C, E), jnp.float32) * s,
        "b_agg": jax.random.normal(ks[7], (1, E), jnp.float32) * s,
        # weight gate: Linear(EC,2EC) -> Linear(2EC,EC) -> Linear(EC,C) -> softmax
        "w_g1": jax.random.normal(ks[8], (E * C, 2 * E * C), jnp.float32) * s,
        "b_g1": jax.random.normal(ks[9], (1, 2 * E * C), jnp.float32) * s,
        "w_g2": jax.random.normal(ks[10], (2 * E * C, E * C), jnp.float32) * s,
        "b_g2": jax.random.normal(ks[11], (1, E * C), jnp.float32) * s,
        "w_g3": jax.random.normal(ks[12], (E * C, C), jnp.float32) * s,
        "b_g3": jax.random.normal(ks[13], (1, C), jnp.float32) * s,
    }


def my_model_forward(params, users, pos_items, neg_items, *,
                     embed_size, client_count, tile=128,
                     matmul_dtype=jnp.float32):
    E, C = embed_size, client_count
    U = params["embed_user"].shape[1]
    I = params["embed_item"].shape[1]

    # concat [server, client_0, ..., client_{C-2}] along features, then stack
    # users over items so the whole computer() runs in ONE pallas_call.
    # TODO(synk): for very large tables store them pre-concatenated to avoid
    # this extra HBM read+write, and/or compute only the gathered rows.
    x_user = jnp.concatenate([params["embed_user"][c] for c in range(C)], axis=-1)
    x_item = jnp.concatenate([params["embed_item"][c] for c in range(C)], axis=-1)
    x_all = jnp.concatenate([x_user, x_item], axis=0)          # (U+I, E*C)

    packed = pack_params(params, embed_size=E, client_count=C,
                         matmul_dtype=matmul_dtype)
    all_embed = computer_pallas(x_all, packed, embed_size=E,
                                client_count=C, tile=tile)
    all_embed_user = all_embed[:U]                             # (U, E)
    all_embed_item = all_embed[U:U + I]                        # (I, E)

    eu = all_embed_user[users]          # (B, E)   gather glue in plain JAX
    ep = all_embed_item[pos_items]
    en = all_embed_item[neg_items]
    pos_scores = jnp.sum(eu * ep, axis=-1)
    neg_scores = jnp.sum(eu * en, axis=-1)
    return pos_scores, neg_scores


if __name__ == "__main__":
    USER_COUNT = 128
    ITEM_COUNT = 128
    EMBED_SIZE = 32
    CLIENT_COUNT = 3          # server + 2 clients
    BATCH = 8
    TILE = 128                # (U+I)=256 rows -> 2 parallel grid steps

    key = jax.random.PRNGKey(0)
    k_param, k_u, k_p, k_n = jax.random.split(key, 4)

    params = init_params(k_param, USER_COUNT, ITEM_COUNT, EMBED_SIZE, CLIENT_COUNT)

    users = jax.random.randint(k_u, (BATCH,), 0, USER_COUNT)
    pos_items = jax.random.randint(k_p, (BATCH,), 0, ITEM_COUNT)
    neg_items = jax.random.randint(k_n, (BATCH,), 0, ITEM_COUNT)
    # seqs are accepted by the torch forward but never used inside computer();
    # they are omitted here on purpose.

    fwd = jax.jit(functools.partial(
        my_model_forward, embed_size=EMBED_SIZE, client_count=CLIENT_COUNT,
        tile=TILE, matmul_dtype=jnp.float32))   # use jnp.bfloat16 on v6e/v7x

    pos_scores, neg_scores = fwd(params, users, pos_items, neg_items)

    jax.block_until_ready((pos_scores, neg_scores))
    assert pos_scores.shape == (BATCH,) and neg_scores.shape == (BATCH,)
    assert jnp.all(jnp.isfinite(pos_scores)) and jnp.all(jnp.isfinite(neg_scores))
    print("KERNEL_OK")
</pallas_src>

<mosaic_0001>
module attributes {stable_mosaic.version = 11 : i64} {
  func.func @_computer_kernel(%arg0: i32, %arg1: memref<128x96xf32, #tpu.memory_space<vmem>>, %arg2: memref<96x96xf32, #tpu.memory_space<vmem>>, %arg3: memref<96x224xf32, #tpu.memory_space<vmem>>, %arg4: memref<192x96xf32, #tpu.memory_space<vmem>>, %arg5: memref<96x3xf32, #tpu.memory_space<vmem>>, %arg6: memref<4x224xf32, #tpu.memory_space<vmem>>, %arg7: memref<128x128xf32, #tpu.memory_space<vmem>>) attributes {dimension_semantics = [#tpu.dimension_semantics<parallel>], iteration_bounds = array<i64: 2>, scalar_prefetch = 0 : i64, scratch_operands = 0 : i64, tpu.core_type = #tpu.core_type<tc>, window_params = [{transform_indices = @transform_0, window_bounds = array<i64: 128, 96>}, {pipeline_mode = #tpu.pipeline_mode<synchronous>, transform_indices = @transform_1, window_bounds = array<i64: 96, 96>}, {pipeline_mode = #tpu.pipeline_mode<synchronous>, transform_indices = @transform_2, window_bounds = array<i64: 96, 224>}, {pipeline_mode = #tpu.pipeline_mode<synchronous>, transform_indices = @transform_3, window_bounds = array<i64: 192, 96>}, {pipeline_mode = #tpu.pipeline_mode<synchronous>, transform_indices = @transform_4, window_bounds = array<i64: 96, 3>}, {pipeline_mode = #tpu.pipeline_mode<synchronous>, transform_indices = @transform_5, window_bounds = array<i64: 4, 224>}, {transform_indices = @transform_6, window_bounds = array<i64: 128, 128>}]} {
    %c0 = arith.constant 0 : index
    %c0_0 = arith.constant 0 : index
    %0 = vector.load %arg1[%c0, %c0_0] : memref<128x96xf32, #tpu.memory_space<vmem>>, vector<128x96xf32>
    %c0_1 = arith.constant 0 : index
    %c0_2 = arith.constant 0 : index
    %1 = vector.load %arg2[%c0_1, %c0_2] : memref<96x96xf32, #tpu.memory_space<vmem>>, vector<96x96xf32>
    %cst = arith.constant dense<0.000000e+00> : vector<128x96xf32>
    %2 = tpu.matmul %0, %1, %cst {dimension_numbers = #tpu.dot_dimension_numbers<[1], [0], [0], [1], [0, 0, 1, 1], [], []>} : vector<128x96xf32>, vector<96x96xf32>, vector<128x96xf32> -> vector<128x96xf32>
    %c0_3 = arith.constant 0 : index
    %c0_4 = arith.constant 0 : index
    %3 = vector.load %arg6[%c0_3, %c0_4] : memref<4x224xf32, #tpu.memory_space<vmem>>, vector<1x96xf32>
    %4 = vector.broadcast %3 : vector<1x96xf32> to vector<128x96xf32>
    %5 = arith.addf %2, %4 : vector<128x96xf32>
    %c0_5 = arith.constant 0 : index
    %c0_6 = arith.constant 0 : index
    %6 = vector.load %arg3[%c0_5, %c0_6] : memref<96x224xf32, #tpu.memory_space<vmem>>, vector<96x224xf32>
    %cst_7 = arith.constant dense<0.000000e+00> : vector<128x224xf32>
    %7 = tpu.matmul %5, %6, %cst_7 {dimension_numbers = #tpu.dot_dimension_numbers<[1], [0], [0], [1], [0, 0, 1, 1], [], []>} : vector<128x96xf32>, vector<96x224xf32>, vector<128x224xf32> -> vector<128x224xf32>
    %c1 = arith.constant 1 : index
    %c0_8 = arith.constant 0 : index
    %8 = vector.load %arg6[%c1, %c0_8] : memref<4x224xf32, #tpu.memory_space<vmem>>, vector<1x224xf32>
    %9 = vector.broadcast %8 : vector<1x224xf32> to vector<128x224xf32>
    %10 = arith.addf %7, %9 : vector<128x224xf32>
    %11 = vector.extract_strided_slice %10 {offsets = [0, 0], sizes = [128, 32], strides = [1, 1]} : vector<128x224xf32> to vector<128x32xf32>
    %12 = vector.extract_strided_slice %10 {offsets = [0, 32], sizes = [128, 192], strides = [1, 1]} : vector<128x224xf32> to vector<128x192xf32>
    %c0_9 = arith.constant 0 : index
    %c0_10 = arith.constant 0 : index
    %13 = vector.load %arg4[%c0_9, %c0_10] : memref<192x96xf32, #tpu.memory_space<vmem>>, vector<192x96xf32>
    %cst_11 = arith.constant dense<0.000000e+00> : vector<128x96xf32>
    %14 = tpu.matmul %12, %13, %cst_11 {dimension_numbers = #tpu.dot_dimension_numbers<[1], [0], [0], [1], [0, 0, 1, 1], [], []>} : vector<128x192xf32>, vector<192x96xf32>, vector<128x96xf32> -> vector<128x96xf32>
    %c2 = arith.constant 2 : index
    %c0_12 = arith.constant 0 : index
    %15 = vector.load %arg6[%c2, %c0_12] : memref<4x224xf32, #tpu.memory_space<vmem>>, vector<1x96xf32>
    %16 = vector.broadcast %15 : vector<1x96xf32> to vector<128x96xf32>
    %17 = arith.addf %14, %16 : vector<128x96xf32>
    %c0_13 = arith.constant 0 : index
    %c0_14 = arith.constant 0 : index
    %18 = vector.load %arg5[%c0_13, %c0_14] : memref<96x3xf32, #tpu.memory_space<vmem>>, vector<96x3xf32>
    %cst_15 = arith.constant dense<0.000000e+00> : vector<128x3xf32>
    %19 = tpu.matmul %17, %18, %cst_15 {dimension_numbers = #tpu.dot_dimension_numbers<[1], [0], [0], [1], [0, 0, 1, 1], [], []>} : vector<128x96xf32>, vector<96x3xf32>, vector<128x3xf32> -> vector<128x3xf32>
    %c3 = arith.constant 3 : index
    %c0_16 = arith.constant 0 : index
    %20 = vector.load %arg6[%c3, %c0_16] : memref<4x224xf32, #tpu.memory_space<vmem>>, vector<1x3xf32>
    %21 = vector.broadcast %20 : vector<1x3xf32> to vector<128x3xf32>
    %22 = arith.addf %19, %21 : vector<128x3xf32>
    %cst_17 = arith.constant dense<0xFF800000> : vector<128xf32>
    %23 = vector.multi_reduction <maximumf>, %22, %cst_17 [1] : vector<128x3xf32> to vector<128xf32>
    %24 = vector.shape_cast %23 : vector<128xf32> to vector<128x1xf32>
    %25 = vector.broadcast %24 : vector<128x1xf32> to vector<128x3xf32>
    %26 = arith.subf %22, %25 : vector<128x3xf32>
    %27 = math.exp %26 : vector<128x3xf32>
    %cst_18 = arith.constant dense<0.000000e+00> : vector<128xf32>
    %28 = vector.multi_reduction <add>, %27, %cst_18 [1] : vector<128x3xf32> to vector<128xf32>
    %29 = vector.shape_cast %28 : vector<128xf32> to vector<128x1xf32>
    %30 = tpu.reciprocal %29 {approx = true} : vector<128x1xf32> -> vector<128x1xf32>
    %31 = vector.broadcast %30 : vector<128x1xf32> to vector<128x3xf32>
    %32 = arith.mulf %27, %31 : vector<128x3xf32>
    %33 = vector.extract_strided_slice %5 {offsets = [0, 0], sizes = [128, 32], strides = [1, 1]} : vector<128x96xf32> to vector<128x32xf32>
    %34 = vector.extract_strided_slice %32 {offsets = [0, 0], sizes = [128, 1], strides = [1, 1]} : vector<128x3xf32> to vector<128x1xf32>
    %35 = vector.broadcast %34 : vector<128x1xf32> to vector<128x32xf32>
    %36 = arith.mulf %33, %35 : vector<128x32xf32>
    %37 = vector.extract_strided_slice %5 {offsets = [0, 32], sizes = [128, 32], strides = [1, 1]} : vector<128x96xf32> to vector<128x32xf32>
    %38 = vector.extract_strided_slice %32 {offsets = [0, 1], sizes = [128, 1], strides = [1, 1]} : vector<128x3xf32> to vector<128x1xf32>
    %39 = vector.broadcast %38 : vector<128x1xf32> to vector<128x32xf32>
    %40 = arith.mulf %37, %39 : vector<128x32xf32>
    %41 = arith.addf %36, %40 : vector<128x32xf32>
    %42 = vector.extract_strided_slice %5 {offsets = [0, 64], sizes = [128, 32], strides = [1, 1]} : vector<128x96xf32> to vector<128x32xf32>
    %43 = vector.extract_strided_slice %32 {offsets = [0, 2], sizes = [128, 1], strides = [1, 1]} : vector<128x3xf32> to vector<128x1xf32>
    %44 = vector.broadcast %43 : vector<128x1xf32> to vector<128x32xf32>
    %45 = arith.mulf %42, %44 : vector<128x32xf32>
    %46 = arith.addf %41, %45 : vector<128x32xf32>
    %cst_19 = arith.constant 5.000000e-01 : f32
    %47 = vector.broadcast %cst_19 : f32 to vector<128x32xf32>
    %48 = arith.mulf %47, %11 : vector<128x32xf32>
    %cst_20 = arith.constant 5.000000e-01 : f32
    %49 = vector.broadcast %cst_20 : f32 to vector<128x32xf32>
    %50 = arith.mulf %49, %46 : vector<128x32xf32>
    %51 = arith.addf %48, %50 : vector<128x32xf32>
    %cst_21 = arith.constant 0.000000e+00 : f32
    %52 = vector.broadcast %cst_21 : f32 to vector<128x96xf32>
    %53 = tpu.concatenate %51, %52 in 1 : vector<128x32xf32>, vector<128x96xf32> -> vector<128x128xf32>
    %c0_22 = arith.constant 0 : index
    %c0_23 = arith.constant 0 : index
    %54 = vector.load %arg7[%c0_22, %c0_23] : memref<128x128xf32, #tpu.memory_space<vmem>>, vector<128x128xf32>
    tpu.vector_store %arg7[%c0_22, %c0_23], %53 {strides = array<i32>} : memref<128x128xf32, #tpu.memory_space<vmem>>, vector<128x128xf32>,
    return
  }
  func.func @transform_0(%arg0: i32) -> (i32, i32) {
    %c0_i32 = arith.constant 0 : i32
    %c0_i32_0 = arith.constant 0 : i32
    return %arg0, %c0_i32 : i32, i32
  }
  func.func @transform_1(%arg0: i32) -> (i32, i32) {
    %c0_i32 = arith.constant 0 : i32
    %c0_i32_0 = arith.constant 0 : i32
    %c0_i32_1 = arith.constant 0 : i32
    return %c0_i32, %c0_i32_0 : i32, i32
  }
  func.func @transform_2(%arg0: i32) -> (i32, i32) {
    %c0_i32 = arith.constant 0 : i32
    %c0_i32_0 = arith.constant 0 : i32
    %c0_i32_1 = arith.constant 0 : i32
    return %c0_i32, %c0_i32_0 : i32, i32
  }
  func.func @transform_3(%arg0: i32) -> (i32, i32) {
    %c0_i32 = arith.constant 0 : i32
    %c0_i32_0 = arith.constant 0 : i32
    %c0_i32_1 = arith.constant 0 : i32
    return %c0_i32, %c0_i32_0 : i32, i32
  }
  func.func @transform_4(%arg0: i32) -> (i32, i32) {
    %c0_i32 = arith.constant 0 : i32
    %c0_i32_0 = arith.constant 0 : i32
    %c0_i32_1 = arith.constant 0 : i32
    return %c0_i32, %c0_i32_0 : i32, i32
  }
  func.func @transform_5(%arg0: i32) -> (i32, i32) {
    %c0_i32 = arith.constant 0 : i32
    %c0_i32_0 = arith.constant 0 : i32
    %c0_i32_1 = arith.constant 0 : i32
    return %c0_i32, %c0_i32_0 : i32, i32
  }
  func.func @transform_6(%arg0: i32) -> (i32, i32) {
    %c0_i32 = arith.constant 0 : i32
    %c0_i32_0 = arith.constant 0 : i32
    return %arg0, %c0_i32 : i32, i32
  }
}

</mosaic_0001>

<bundles_post_ra>
// kernel: my_model_forward.1
= control target key start
LH: loop header
LB: loop body
LE: loop exit
PB: predicated region body
PF: predicated region fallthrough
CT: control target
= control target key end

     0   :  { %s2517_s21 = smov 0   ;;  %s3431_s0 = inlined_call_operand.vmem [shape: f32[256,96], index: 0, kind: input, shape index: {}]   ;;  %s3432_s1 = inlined_call_operand.vmem [shape: f32[96,96], index: 1, kind: input, shape index: {}]   ;;  %s3433_s2 = inlined_call_operand.vmem [shape: f32[96,224], index: 2, kind: input, shape index: {}]   ;;  %s3434_s3 = inlined_call_operand.vmem [shape: f32[192,96], index: 3, kind: input, shape index: {}]   ;;  %s3435_s4 = inlined_call_operand.vmem [shape: f32[96,3], index: 4, kind: input, shape index: {}]   ;;  %s3436_s5 = inlined_call_operand.vmem [shape: f32[4,224], index: 5, kind: input, shape index: {}]   ;;  %s3437_s6 = inlined_call_operand.vmem [shape: f32[256,128], index: 6, kind: output, shape index: {}]  }
   0x1 LB: > { %s2003_s22 = sadd.s32 4294967295, %s2473_s21   ;;  %p2007_p0 = scmp.ge.s32.totalorder %s2473_s21, 1  ;;  %s2473_s21 = sphi %s2517_s21, %s16_s21  }
   0x2   : > { %p213_p1 = scmp.lt.s32.totalorder %s2473_s21, 3 }
   0x4   : > { %p214_p2 = pnand %p2007_p0, %p213_p1 }
   0x5   : > { %v271_v0 = vld [vmem:[%s3432_s1] sm:$0xff] (!%p214_p2)  ;;  %v272_v1 = vld [vmem:[%s3432_s1 + $0x8] sm:$0xff] (!%p214_p2)  ;;  %v273_v2 = vld [vmem:[%s3432_s1 + $0x10] sm:$0xff] (!%p214_p2)  ;;  %s2008_s29 = sshll.u32 (!%p214_p2), %s2003_s22, 4  ;;  %vm288_vm0 = vcmask (!%p214_p2), 785408   ;;  %s2477_s25 = smov (!%p214_p2), 96  }
   0x6   : > { %217 = sbr.rel (%p214_p2) target bundleno = 1720 (0x6b8), region = 44  ;;  %v2234_v3 = vpack.c.bf16 (!%p214_p2), %v272_v1, %v271_v0  ;;  %v274_v4 = vld [vmem:[%s3432_s1 + $0x18] sm:$0xff] (!%p214_p2)  ;;  %p244_p3 = scmp.lt.s32.totalorder (!%p214_p2), %s2008_s29, 31  ;;  %v275_v6 = vld [vmem:[%s3432_s1 + $0x20] sm:$0xff] (!%p214_p2)  ;;  %v276_v7 = vld [vmem:[%s3432_s1 + $0x28] sm:$0xff] (!%p214_p2)  ;;  %vm885_vm1 = vcmask (!%p214_p2), 523264  }
   0x7   : > { %v2238_v5 = vpack.c.bf16 (!%p214_p2), %v274_v4, %v273_v2  ;;  %v277_v8 = vld [vmem:[%s3432_s1 + $0x30] sm:$0xff] (!%p214_p2)  ;;  %v483_v9 = vld [vmem:[%s3433_s2 + $0x8] sm:$0xff] (!%p214_p2)  ;;  %v485_v10 = vld [vmem:[%s3433_s2 + $0x18] sm:$0xff] (!%p214_p2)  ;;  %v2242_v12 = vpack.c.bf16 (!%p214_p2), %v276_v7, %v275_v6  ;;  %v2475_v6 = vmov (!%p214_p2), 0.0   ;;  %vm1273_vm2 = vcmask (!%p214_p2), 23552   ;;  %s2481_s12 = smov (!%p214_p2), 64  }
   0x8   : > { %2235 = vmatprep.subr.bf16.mxu0 (!%p214_p2), %v2234_v3  ;;  %v482_v11 = vld [vmem:[%s3433_s2] sm:$0xff] (!%p214_p2)  ;;  %v2258_v13 = vpack.c.bf16 (!%p214_p2), %v485_v10, %v483_v9  ;;  %v484_v14 = vld [vmem:[%s3433_s2 + $0x10] sm:$0xff] (!%p214_p2)  ;;  %v487_v15 = vld [vmem:[%s3433_s2 + $0x28] sm:$0xff] (!%p214_p2)  ;;  %631 = vmatprep.mubr.f32.mxu1 (!%p214_p2), %v2475_v6  ;;  %vm1914_vm3 = vcmask (!%p214_p2), 261120  }
   0x9   : > { %2237 = vmatpush3.bf16.msra.mxu0 (!%p214_p2), %v2234_v3  ;;  %v489_v16 = vld [vmem:[%s3433_s2 + $0x38] sm:$0xff] (!%p214_p2)  ;;  %v2260_v18 = vpack.c.bf16 (!%p214_p2), %v484_v14, %v482_v11  ;;  %v486_v20 = vld [vmem:[%s3433_s2 + $0x20] sm:$0xff] (!%p214_p2)  ;;  %v488_v21 = vld [vmem:[%s3433_s2 + $0x30] sm:$0xff] (!%p214_p2) }
   0xa   : > { %2239 = vmatprep.subr.bf16.mxu0 (!%p214_p2), %v2238_v5  ;;  %v278_v17 = vld [vmem:[%s3432_s1 + $0x38] sm:$0xff] (!%p214_p2)  ;;  %v2262_v19 = vpack.c.bf16 (!%p214_p2), %v489_v16, %v487_v15  ;;  %2259 = vmatprep.subr.bf16.mxu1 (!%p214_p2), %v2258_v13  ;;  %v2264_v24 = vpack.c.bf16 (!%p214_p2), %v488_v21, %v486_v20  ;;  %v279_v25 = vld [vmem:[%s3432_s1 + $0x40] sm:$0xff] (!%p214_p2)  ;;  %v280_v26 = vld [vmem:[%s3432_s1 + $0x48] sm:$0xff] (!%p214_p2) }
   0xb   : > { %v2246_v23 = vpack.c.bf16 (!%p214_p2), %v278_v17, %v277_v8  ;;  %2261 = vmatpush1.bf16.msra.mxu1 (!%p214_p2), %v2260_v18  ;;  %v491_v27 = vld [vmem:[%s3433_s2 + $0x48] sm:$0xff] (!%p214_p2)  ;;  %v281_v28 = vld [vmem:[%s3432_s1 + $0x50] sm:$0xff] (!%p214_p2)  ;;  %v493_v29 = vld [vmem:[%s3433_s2 + $0x58] sm:$0xff] (!%p214_p2)  ;;  %v2250_v31 = vpack.c.bf16 (!%p214_p2), %v280_v26, %v279_v25 }
   0xc   : > { %2263 = vmatprep.subr.bf16.mxu1 (!%p214_p2), %v2262_v19  ;;  %v490_v30 = vld [vmem:[%s3433_s2 + $0x40] sm:$0xff] (!%p214_p2)  ;;  %v2266_v32 = vpack.c.bf16 (!%p214_p2), %v493_v29, %v491_v27  ;;  %v492_v33 = vld [vmem:[%s3433_s2 + $0x50] sm:$0xff] (!%p214_p2)  ;;  %v495_v34 = vld [vmem:[%s3433_s2 + $0x68] sm:$0xff] (!%p214_p2) }
   0xd   : > { %s3439_s29 = smov (!%p244_p3, %s2008_s29), 31  ;;  %2241 = vmatpush3.bf16.msra.mxu0 %v2238_v5  ;;  %v497_v35 = vld [vmem:[%s3433_s2 + $0x78] sm:$0xff]  ;;  %v2268_v37 = vpack.c.bf16 %v492_v33, %v490_v30  ;;  %v494_v39 = vld [vmem:[%s3433_s2 + $0x60] sm:$0xff]  ;;  %v496_v40 = vld [vmem:[%s3433_s2 + $0x70] sm:$0xff] }
   0xe   : > { %s2009_s20 = sshll.u32 %s3439_s29, 3  ;;  %2243 = vmatprep.subr.bf16.mxu0 %v2242_v12  ;;  %v282_v36 = vld [vmem:[%s3432_s1 + $0x58] sm:$0xff]  ;;  %v2270_v38 = vpack.c.bf16 %v497_v35, %v495_v34  ;;  %v499_v41 = vld [vmem:[%s3433_s2 + $0x88] sm:$0xff]  ;;  %v2272_v44 = vpack.c.bf16 %v496_v40, %v494_v39  ;;  %v498_v46 = vld [vmem:[%s3433_s2 + $0x80] sm:$0xff] }
   0xf   : > { %s2575_s9 = scalar_lea.vmem %s3431_s0, %s2009_s20  ;;  %2265 = vmatpush1.bf16.msra.mxu1 %v2264_v24  ;;  %v501_v42 = vld [vmem:[%s3433_s2 + $0x98] sm:$0xff]  ;;  %v2254_v43 = vpack.c.bf16 %v282_v36, %v281_v28  ;;  %v500_v47 = vld [vmem:[%s3433_s2 + $0x90] sm:$0xff]  ;;  %v503_v0 = vld [vmem:[%s3433_s2 + $0xa8] sm:$0xff]  ;;  %s3343_s14 = scalar_lea.vmem %s3437_s6, %s2009_s20 }
  0x10   : > { %v255_v22 = vld [vmem:[%s2575_s9] sm:$0xff]  ;;  %2267 = vmatprep.subr.bf16.mxu1 %v2266_v32  ;;  %v2274_v45 = vpack.c.bf16 %v501_v42, %v499_v41  ;;  %v2276_v48 = vpack.c.bf16 %v500_v47, %v498_v46  ;;  %v256_v49 = vld [vmem:[%s2575_s9 + $0x8] sm:$0xff]  ;;  %v257_v50 = vld [vmem:[%s2575_s9 + $0x10] sm:$0xff] }
  0x11   : > { %2162 = vmatprep.mubr.msk.f32.mxu0 %vm288_vm0, %v255_v22  ;;  %2245 = vmatpush3.bf16.msra.mxu0 %v2242_v12  ;;  %v258_v51 = vld [vmem:[%s2575_s9 + $0x18] sm:$0xff]  ;;  %v259_v52 = vld [vmem:[%s2575_s9 + $0x20] sm:$0xff]  ;;  %v260_v53 = vld [vmem:[%s2575_s9 + $0x28] sm:$0xff] }
  0x12   : > { %2247 = vmatprep.subr.bf16.mxu0 %v2246_v23  ;;  %v261_v54 = vld [vmem:[%s2575_s9 + $0x30] sm:$0xff]  ;;  %v262_v55 = vld [vmem:[%s2575_s9 + $0x38] sm:$0xff]  ;;  %v263_v56 = vld [vmem:[%s2575_s9 + $0x40] sm:$0xff] }
  0x13   : > { %2269 = vmatpush1.bf16.msra.mxu1 %v2268_v37  ;;  %v264_v57 = vld [vmem:[%s2575_s9 + $0x48] sm:$0xff]  ;;  %v265_v58 = vld [vmem:[%s2575_s9 + $0x50] sm:$0xff]  ;;  %v266_v59 = vld [vmem:[%s2575_s9 + $0x58] sm:$0xff] }
  0x14   : > { %2271 = vmatprep.subr.bf16.mxu1 %v2270_v38  ;;  %v267_v60 = vld [vmem:[%s2575_s9 + $0x60] sm:$0xff]  ;;  %v268_v61 = vld [vmem:[%s2575_s9 + $0x68] sm:$0xff]  ;;  %v269_v62 = vld [vmem:[%s2575_s9 + $0x70] sm:$0xff] }
  0x15   : > { %2249 = vmatpush3.bf16.msra.mxu0 %v2246_v23  ;;  %v270_v63 = vld [vmem:[%s2575_s9 + $0x78] sm:$0xff]  ;;  %v502_v3 = vld [vmem:[%s3433_s2 + $0xa0] sm:$0xff]  ;;  %v504_v4 = vld [vmem:[%s3433_s2 + $0xb0] sm:$0xff] }
  0x16   : > { %2251 = vmatprep.subr.bf16.mxu0 %v2250_v31  ;;  %v505_v1 = vld [vmem:[%s3433_s2 + $0xb8] sm:$0xff]  ;;  %v2280_v5 = vpack.c.bf16 %v504_v4, %v502_v3  ;;  %v2012_v7 = vld [vmem:[%s3436_s5] ss:$0 sm:$0xff]  ;;  %v729_v41 = vld [vmem:[%s3434_s3 + $0x8] sm:$0xff] }
  0x17   : > { %2273 = vmatpush1.bf16.msra.mxu1 %v2272_v44  ;;  %v2278_v2 = vpack.c.bf16 %v505_v1, %v503_v0  ;;  %v728_v40 = vld [vmem:[%s3434_s3] sm:$0xff]  ;;  %v730_v42 = vld [vmem:[%s3434_s3 + $0x10] sm:$0xff] }
  0x18   : > { %2275 = vmatprep.subr.bf16.mxu1 %v2274_v45  ;;  %v2283_v44 = vpack.c.bf16 %v729_v41, %v728_v40  ;;  %v731_v45 = vld [vmem:[%s3434_s3 + $0x18] sm:$0xff]  ;;  %v732_v47 = vld [vmem:[%s3434_s3 + $0x20] sm:$0xff]  ;;  %v746_v4 = vld [vmem:[%s3434_s3 + $0x90] sm:$0xff] }
  0x19   : > { %2253 = vmatpush3.bf16.msra.mxu0 %v2250_v31  ;;  %v2286_v46 = vpack.c.bf16 %v731_v45, %v730_v42  ;;  %v744_v1 = vld [vmem:[%s3434_s3 + $0x80] sm:$0xff] }
  0x1a   : > { %2255 = vmatprep.subr.bf16.mxu0 %v2254_v43 }
  0x1b   : > { %2277 = vmatpush1.bf16.msra.mxu1 %v2276_v48  ;;  %v733_v48 = vld [vmem:[%s3434_s3 + $0x28] sm:$0xff] }
  0x1c   : > { %2279 = vmatprep.subr.bf16.mxu1 %v2278_v2  ;;  %v745_v2 = vld [vmem:[%s3434_s3 + $0x88] sm:$0xff] }
  0x1d   : > { %2257 = vmatpush3.bf16.msra.mxu0 %v2254_v43  ;;  %v2476_v43 = vmov 0.0|0.0   ;;  %v2307_v3 = vpack.c.bf16 %v745_v2, %v744_v1 }
  0x1e   : > { %2282 = vmatprep.subr.bf16.mxu0 %v2476_v43 }
  0x1f   : > { %2281 = vmatpush1.bf16.msra.mxu1 %v2280_v5  ;;  %v747_v5 = vld [vmem:[%s3434_s3 + $0x98] sm:$0xff] }
  0x20   : > { %2163 = vmatmul.mubr.msk.f32.vlgmr.msra.gmra.mrb[0].mxu0 %vm288_vm0, %v256_v49  ;;  %v2289_v49 = vpack.c.bf16 %v733_v48, %v732_v47 }
  0x21   : > { %2165 = vmatprep.mubr.msk.f32.mxu0 %vm288_vm0, %v257_v50  ;;  %2284 = vmatpush1.bf16.msra.mxu0 %v2283_v44  ;;  %v734_v50 = vld [vmem:[%s3434_s3 + $0x30] sm:$0xff] }
  0x22   : > { %2285 = vmatprep.subr.bf16.mxu0 %v2476_v43 }
  0x24   : > { %2166 = vmatmul.mubr.msk.f32.gmra.mrb[2].mxu0 %vm288_vm0, %v258_v51  ;;  %v735_v51 = vld [vmem:[%s3434_s3 + $0x38] sm:$0xff] }
  0x25   : > { %2168 = vmatprep.mubr.msk.f32.mxu0 %vm288_vm0, %v259_v52  ;;  %2287 = vmatpush1.bf16.msra.mxu0 %v2286_v46  ;;  %v2292_v52 = vpack.c.bf16 %v735_v51, %v734_v50 }
  0x26   : > { %2288 = vmatprep.subr.bf16.mxu0 %v2476_v43 }
  0x28   : > { %2169 = vmatmul.mubr.msk.f32.gmra.mrb[4].mxu0 %vm288_vm0, %v260_v53  ;;  %v736_v53 = vld [vmem:[%s3434_s3 + $0x40] sm:$0xff] }
  0x29   : > { %2171 = vmatprep.mubr.msk.f32.mxu0 %vm288_vm0, %v261_v54  ;;  %2290 = vmatpush1.bf16.msra.mxu0 %v2289_v49  ;;  %v737_v54 = vld [vmem:[%s3434_s3 + $0x48] sm:$0xff] }
  0x2a   : > { %2291 = vmatprep.subr.bf16.mxu0 %v2476_v43 }
  0x2c   : > { %2172 = vmatmul.mubr.msk.f32.gmra.mrb[6].mxu0 %vm288_vm0, %v262_v55  ;;  %v2295_v55 = vpack.c.bf16 %v737_v54, %v736_v53 }
  0x2d   : > { %2174 = vmatprep.mubr.msk.f32.mxu0 %vm288_vm0, %v263_v56  ;;  %2293 = vmatpush1.bf16.msra.mxu0 %v2292_v52  ;;  %v738_v56 = vld [vmem:[%s3434_s3 + $0x50] sm:$0xff] }
  0x2e   : > { %2294 = vmatprep.subr.bf16.mxu0 %v2476_v43 }
  0x30   : > { %2175 = vmatmul.mubr.msk.f32.gmra.mrb[8].mxu0 %vm288_vm0, %v264_v57  ;;  %v739_v57 = vld [vmem:[%s3434_s3 + $0x58] sm:$0xff] }
  0x31   : > { %2177 = vmatprep.mubr.msk.f32.mxu0 %vm288_vm0, %v265_v58  ;;  %2296 = vmatpush1.bf16.msra.mxu0 %v2295_v55  ;;  %v2298_v58 = vpack.c.bf16 %v739_v57, %v738_v56 }
  0x32   : > { %2297 = vmatprep.subr.bf16.mxu0 %v2476_v43 }
  0x34   : > { %2178 = vmatmul.mubr.msk.f32.gmra.mrb[10].mxu0 %vm288_vm0, %v266_v59  ;;  %v740_v59 = vld [vmem:[%s3434_s3 + $0x60] sm:$0xff] }
  0x35   : > { %2180 = vmatprep.mubr.msk.f32.mxu0 %vm288_vm0, %v267_v60  ;;  %v741_v60 = vld [vmem:[%s3434_s3 + $0x68] sm:$0xff]  ;;  %2299 = vmatpush1.bf16.msra.mxu0 %v2298_v58 }
  0x36   : > { %2300 = vmatprep.subr.bf16.mxu0 %v2476_v43 }
  0x38   : > { %2181 = vmatmul.mubr.msk.f32.gmra.mrb[12].mxu0 %vm288_vm0, %v268_v61  ;;  %v2301_v61 = vpack.c.bf16 %v741_v60, %v740_v59 }
  0x39   : > { %2183 = vmatprep.mubr.msk.f32.mxu0 %vm288_vm0, %v269_v62  ;;  %v742_v62 = vld [vmem:[%s3434_s3 + $0x70] sm:$0xff] }
  0x3a   : > { %2302 = vmatpush1.bf16.msra.mxu0 %v2301_v61 }
  0x3b   : > { %2303 = vmatprep.subr.bf16.mxu0 %v2476_v43 }
  0x3c   : > { %2184 = vmatmul.mubr.msk.f32.gmra.mrb[14].mxu0 %vm288_vm0, %v270_v63  ;;  %v743_v63 = vld [vmem:[%s3434_s3 + $0x78] sm:$0xff] }
  0x3d   : > { %v2304_v0 = vpack.c.bf16 %v743_v63, %v742_v62 }
  0x3f   : > { %2305 = vmatpush1.bf16.msra.mxu0 %v2304_v0 }
  0x40   : > { %2306 = vmatprep.subr.bf16.mxu0 %v2476_v43 }
  0x43   : > { %2308 = vmatpush1.bf16.msra.mxu0 %v2307_v3 }
  0x44   : > { %2309 = vmatprep.subr.bf16.mxu0 %v2476_v43 }
  0xf3   : > { %v2164_v8 = vpop.f32.mrb[0].mxu0 }
  0xf4   : > { %v403_v9 = vpop.f32.mrb[1].mxu0  ;;  %v2684_v13 = vadd.f32 %v2164_v8, %v2012_v7  ;;  %v749_v8 = vld [vmem:[%s3434_s3 + $0xa8] sm:$0xff] }
  0xf5   : > { %v2679_v10 = vadd.f32 %v2012_v7, %v403_v9 }
  0xf7   : > { %2030 = vmatmul.mubr.msk.f32.vlgmr.msra.gmra.mrb[0].mxu1 %vm288_vm0, %v2679_v10  ;;  %v2167_v11 = vpop.f32.mrb[2].mxu0 }
  0xf8   : > { %637 = vmatprep.mubr.f32.mxu1 %v2475_v6  ;;  %v413_v12 = vpop.f32.mrb[3].mxu0  ;;  %v2691_v17 = vadd.f32 %v2167_v11, %v2012_v7  ;;  %v509_v11 = vlaneseq }
  0xf9   : > { %v2688_v14 = vadd.f32 %v2012_v7, %v413_v12 }
  0xfa   : > { %v510_v12 = vshrl.u32 %v509_v11, 7 }
  0xfb   : > { %2031 = vmatmul.mubr.msk.f32.gmra.mrb[2].mxu1 %vm288_vm0, %v2684_v13  ;;  %v2170_v15 = vpop.f32.mrb[4].mxu0 }
  0xfc   : > { %643 = vmatprep.mubr.f32.mxu1 %v2475_v6  ;;  %v423_v16 = vpop.f32.mrb[5].mxu0  ;;  %v2701_v23 = vadd.f32 %v2170_v15, %v2012_v7  ;;  %v750_v15 = vld [vmem:[%s3434_s3 + $0xb0] sm:$0xff] }
  0xfd   : > { %v2698_v20 = vadd.f32 %v2012_v7, %v423_v16  ;;  %v751_v16 = vld [vmem:[%s3434_s3 + $0xb8] sm:$0xff] }
  0xff   : > { %2032 = vmatmul.mubr.msk.f32.gmra.mrb[4].mxu1 %vm288_vm0, %v2688_v14  ;;  %v2173_v18 = vpop.f32.mrb[6].mxu0 }
 0x100   : > { %649 = vmatprep.mubr.f32.mxu1 %v2475_v6  ;;  %v433_v19 = vpop.f32.mrb[7].mxu0  ;;  %v2711_v29 = vadd.f32 %v2173_v18, %v2012_v7  ;;  %v2316_v18 = vpack.c.bf16 %v751_v16, %v750_v15 }
 0x101   : > { %v2708_v26 = vadd.f32 %v2012_v7, %v433_v19  ;;  %v511_v19 = vsub.s32 0, %v510_v12 }
 0x103   : > { %2033 = vmatmul.mubr.msk.f32.gmra.mrb[6].mxu1 %vm288_vm0, %v2691_v17  ;;  %v2176_v21 = vpop.f32.mrb[8].mxu0 }
 0x104   : > { %655 = vmatprep.mubr.f32.mxu1 %v2475_v6  ;;  %v443_v22 = vpop.f32.mrb[9].mxu0  ;;  %v2721_v33 = vadd.f32 %v2176_v21, %v2012_v7  ;;  %v2029_v21 = vld [vmem:[%s3436_s5 + $0x1] ss:$4 sm:$0x3] }
 0x105   : > { %v2718_v32 = vadd.f32 %v2012_v7, %v443_v22  ;;  %v2833_v22 = vrot.slane %v2029_v21, %v511_v19 }
 0x107   : > { %2034 = vmatmul.mubr.msk.f32.gmra.mrb[8].mxu1 %vm288_vm0, %v2698_v20  ;;  %v2179_v24 = vpop.f32.mrb[10].mxu0 }
 0x108   : > { %661 = vmatprep.mubr.f32.mxu1 %v2475_v6  ;;  %v453_v25 = vpop.f32.mrb[11].mxu0  ;;  %v2731_v35 = vadd.f32 %v2179_v24, %v2012_v7  ;;  %v515_v24 = vsub.s32 1, %v510_v12 }
 0x109   : > { %v2728_v34 = vadd.f32 %v2012_v7, %v453_v25 }
 0x10b   : > { %2035 = vmatmul.mubr.msk.f32.gmra.mrb[10].mxu1 %vm288_vm0, %v2701_v23  ;;  %v2182_v27 = vpop.f32.mrb[12].mxu0 }
 0x10c   : > { %667 = vmatprep.mubr.f32.mxu1 %v2475_v6  ;;  %v463_v28 = vpop.f32.mrb[13].mxu0  ;;  %v2741_v37 = vadd.f32 %v2182_v27, %v2012_v7 }
 0x10d   : > { %v2738_v36 = vadd.f32 %v2012_v7, %v463_v28  ;;  %v2838_v28 = vrot.slane %v2029_v21, %v515_v24 }
 0x10f   : > { %2036 = vmatmul.mubr.msk.f32.gmra.mrb[12].mxu1 %vm288_vm0, %v2708_v26  ;;  %v2185_v30 = vpop.f32.mrb[14].mxu0 }
 0x110   : > { %673 = vmatprep.mubr.f32.mxu1 %v2475_v6  ;;  %v473_v31 = vpop.f32.mrb[15].mxu0  ;;  %v2751_v39 = vadd.f32 %v2185_v30, %v2012_v7 }
 0x111   : > { %v2748_v38 = vadd.f32 %v2012_v7, %v473_v31  ;;  %v748_v7 = vld [vmem:[%s3434_s3 + $0xa0] sm:$0xff] }
 0x112   : > { %v2313_v9 = vpack.c.bf16 %v749_v8, %v748_v7 }
 0x113   : > { %2037 = vmatmul.mubr.msk.f32.gmra.mrb[14].mxu1 %vm288_vm0, %v2711_v29 }
 0x114   : > { %679 = vmatprep.mubr.f32.mxu1 %v2475_v6 }
 0x117   : > { %2038 = vmatmul.mubr.msk.f32.gmra.mrb[16].mxu1 %vm288_vm0, %v2718_v32 }
 0x118   : > { %685 = vmatprep.mubr.f32.mxu1 %v2475_v6 }
 0x11b   : > { %2039 = vmatmul.mubr.msk.f32.gmra.mrb[18].mxu1 %vm288_vm0, %v2721_v33 }
 0x11c   : > { %691 = vmatprep.mubr.f32.mxu1 %v2475_v6 }
 0x11f   : > { %2040 = vmatmul.mubr.msk.f32.gmra.mrb[20].mxu1 %vm288_vm0, %v2728_v34 }
 0x120   : > { %697 = vmatprep.mubr.f32.mxu1 %v2475_v6 }
 0x123   : > { %2041 = vmatmul.mubr.msk.f32.gmra.mrb[22].mxu1 %vm288_vm0, %v2731_v35 }
 0x124   : > { %703 = vmatprep.mubr.f32.mxu1 %v2475_v6 }
 0x127   : > { %2042 = vmatmul.mubr.msk.f32.gmra.mrb[24].mxu1 %vm288_vm0, %v2738_v36 }
 0x128   : > { %709 = vmatprep.mubr.f32.mxu1 %v2475_v6 }
 0x12b   : > { %2043 = vmatmul.mubr.msk.f32.gmra.mrb[26].mxu1 %vm288_vm0, %v2741_v37 }
 0x12c   : > { %715 = vmatprep.mubr.f32.mxu1 %v2475_v6 }
 0x12f   : > { %2044 = vmatmul.mubr.msk.f32.gmra.mrb[28].mxu1 %vm288_vm0, %v2748_v38 }
 0x130   : > { %721 = vmatprep.mubr.f32.mxu1 %v2475_v6  ;;  %v2310_v6 = vpack.c.bf16 %v747_v5, %v746_v4 }
 0x132   : > { %2311 = vmatpush1.bf16.msra.mxu0 %v2310_v6 }
 0x133   : > { %2045 = vmatmul.mubr.msk.f32.gmra.mrb[30].mxu1 %vm288_vm0, %v2751_v39  ;;  %2312 = vmatprep.subr.bf16.mxu0 %v2476_v43 }
 0x136   : > { %2314 = vmatpush1.bf16.msra.mxu0 %v2313_v9 }
 0x137   : > { %2315 = vmatprep.subr.bf16.mxu0 %v2476_v43 }
 0x13a   : > { %2317 = vmatpush1.bf16.msra.mxu0 %v2316_v18 }
 0x1ca   : > { %v633_v25 = vpop.f32.mrb[0].mxu1 }
 0x1cb   : > { %v2836_v27 = vadd.f32 %v633_v25, %v2833_v22  ;;  %v635_v30 = vpop.f32.mrb[1].mxu1 }
 0x1cc   : > { %v636_v40 = vadd.f32 %v635_v30, %v2838_v28 }
 0x1cd   : > { %789 = vrot.lane.b32.xlu0 %v2836_v27, %s2477_s25 }
 0x1ce   : > { %v639_v31 = vpop.f32.mrb[2].mxu1 }
 0x1cf   : > { %v2844_v41 = vadd.f32 %v639_v31, %v2833_v22  ;;  %v641_v42 = vpop.f32.mrb[3].mxu1 }
 0x1d0   : > { %v642_v44 = vadd.f32 %v641_v42, %v2838_v28 }
 0x1d1   : > { %793 = vrot.lane.b32.xlu1 %v2844_v41, %s2477_s25  ;;  %791 = vrot.lane.b32.xlu0 %v636_v40, %s2477_s25 }
 0x1d2   : > { %v645_v43 = vpop.f32.mrb[4].mxu1 }
 0x1d3   : > { %v2851_v45 = vadd.f32 %v645_v43, %v2833_v22  ;;  %v647_v46 = vpop.f32.mrb[5].mxu1 }
 0x1d4   : > { %v648_v47 = vadd.f32 %v647_v46, %v2838_v28 }
 0x1d5   : > { %795 = vrot.lane.b32.xlu1 %v642_v44, %s2477_s25  ;;  %797 = vrot.lane.b32.xlu0 %v2851_v45, %s2477_s25 }
 0x1d6   : > { %v651_v48 = vpop.f32.mrb[6].mxu1 }
 0x1d7   : > { %v2858_v49 = vadd.f32 %v651_v48, %v2833_v22  ;;  %v653_v50 = vpop.f32.mrb[7].mxu1 }
 0x1d8   : > { %v654_v51 = vadd.f32 %v653_v50, %v2838_v28  ;;  %v1063_v50 = vld [vmem:[%s3435_s4] sm:$0xff] }
 0x1d9   : > { %799 = vrot.lane.b32.xlu1 %v648_v47, %s2477_s25  ;;  %801 = vrot.lane.b32.xlu0 %v2858_v49, %s2477_s25 }
 0x1da   : > { %v657_v52 = vpop.f32.mrb[8].mxu1 }
 0x1db   : > { %v2865_v53 = vadd.f32 %v657_v52, %v2833_v22  ;;  %v659_v54 = vpop.f32.mrb[9].mxu1 }
 0x1dc   : > { %v660_v55 = vadd.f32 %v659_v54, %v2838_v28 }
 0x1dd   : > { %803 = vrot.lane.b32.xlu1 %v654_v51, %s2477_s25  ;;  %805 = vrot.lane.b32.xlu0 %v2865_v53, %s2477_s25  ;;  %v1064_v51 = vld [vmem:[%s3435_s4 + $0x8] sm:$0xff] }
 0x1de   : > { %v663_v56 = vpop.f32.mrb[10].mxu1  ;;  %v2318_v54 = vpack.c.bf16 %v1064_v51, %v1063_v50 }
 0x1df   : > { %v2872_v57 = vadd.f32 %v663_v56, %v2833_v22  ;;  %v665_v58 = vpop.f32.mrb[11].mxu1  ;;  %v1066_v56 = vld [vmem:[%s3435_s4 + $0x18] sm:$0xff] }
 0x1e0   : > { %v666_v59 = vadd.f32 %v665_v58, %v2838_v28  ;;  %2319 = vmatprep.subr.bf16.mxu1 %v2318_v54 }
 0x1e1   : > { %807 = vrot.lane.b32.xlu1 %v660_v55, %s2477_s25  ;;  %809 = vrot.lane.b32.xlu0 %v2872_v57, %s2477_s25  ;;  %v1065_v55 = vld [vmem:[%s3435_s4 + $0x10] sm:$0xff] }
 0x1e2   : > { %v669_v60 = vpop.f32.mrb[12].mxu1  ;;  %2321 = vmatpush3.bf16.msra.mxu1 %v2318_v54 }
 0x1e3   : > { %v2879_v61 = vadd.f32 %v669_v60, %v2833_v22  ;;  %v671_v62 = vpop.f32.mrb[13].mxu1  ;;  %v2322_v60 = vpack.c.bf16 %v1066_v56, %v1065_v55 }
 0x1e4   : > { %v672_v63 = vadd.f32 %v671_v62, %v2838_v28  ;;  %v1067_v62 = vld [vmem:[%s3435_s4 + $0x20] sm:$0xff] }
 0x1e5   : > { %811 = vrot.lane.b32.xlu1 %v666_v59, %s2477_s25  ;;  %813 = vrot.lane.b32.xlu0 %v2879_v61, %s2477_s25 }
 0x1e6   : > { %v675_v0 = vpop.f32.mrb[14].mxu1  ;;  %2323 = vmatprep.subr.bf16.mxu1 %v2322_v60 }
 0x1e7   : > { %v2886_v1 = vadd.f32 %v675_v0, %v2833_v22  ;;  %v677_v2 = vpop.f32.mrb[15].mxu1  ;;  %2325 = vmatpush3.bf16.msra.mxu1 %v2322_v60 }
 0x1e8   : > { %v678_v3 = vadd.f32 %v677_v2, %v2838_v28 }
 0x1e9   : > { %815 = vrot.lane.b32.xlu1 %v672_v63, %s2477_s25  ;;  %817 = vrot.lane.b32.xlu0 %v2886_v1, %s2477_s25  ;;  %v1068_v63 = vld [vmem:[%s3435_s4 + $0x28] sm:$0xff] }
 0x1ea   : > { %v681_v4 = vpop.f32.mrb[16].mxu1 }
 0x1eb   : > { %v2893_v5 = vadd.f32 %v681_v4, %v2833_v22  ;;  %v683_v6 = vpop.f32.mrb[17].mxu1 }
 0x1ec   : > { %v684_v7 = vadd.f32 %v683_v6, %v2838_v28  ;;  %v2326_v6 = vpack.c.bf16 %v1068_v63, %v1067_v62 }
 0x1ed   : > { %819 = vrot.lane.b32.xlu1 %v678_v3, %s2477_s25  ;;  %821 = vrot.lane.b32.xlu0 %v2893_v5, %s2477_s25 }
 0x1ee   : > { %v687_v8 = vpop.f32.mrb[18].mxu1  ;;  %2327 = vmatprep.subr.bf16.mxu1 %v2326_v6 }
 0x1ef   : > { %v2900_v9 = vadd.f32 %v687_v8, %v2833_v22  ;;  %v689_v11 = vpop.f32.mrb[19].mxu1  ;;  %v1070_v8 = vld [vmem:[%s3435_s4 + $0x38] sm:$0xff]  ;;  %2329 = vmatpush3.bf16.msra.mxu1 %v2326_v6 }
 0x1f0   : > { %v690_v12 = vadd.f32 %v689_v11, %v2838_v28 }
 0x1f1   : > { %823 = vrot.lane.b32.xlu1 %v684_v7, %s2477_s25  ;;  %825 = vrot.lane.b32.xlu0 %v2900_v9, %s2477_s25  ;;  %v1069_v7 = vld [vmem:[%s3435_s4 + $0x30] sm:$0xff] }
 0x1f2   : > { %v693_v15 = vpop.f32.mrb[20].mxu1 }
 0x1f3   : > { %v2907_v16 = vadd.f32 %v693_v15, %v2833_v22  ;;  %v695_v18 = vpop.f32.mrb[21].mxu1  ;;  %v1072_v15 = vld [vmem:[%s3435_s4 + $0x48] sm:$0xff] }
 0x1f4   : > { %v696_v19 = vadd.f32 %v695_v18, %v2838_v28 }
 0x1f5   : > { %827 = vrot.lane.b32.xlu1 %v690_v12, %s2477_s25  ;;  %829 = vrot.lane.b32.xlu0 %v2907_v16, %s2477_s25  ;;  %v1071_v12 = vld [vmem:[%s3435_s4 + $0x40] sm:$0xff] }
 0x1f6   : > { %v699_v21 = vpop.f32.mrb[22].mxu1  ;;  %v2334_v18 = vpack.c.bf16 %v1072_v15, %v1071_v12 }
 0x1f7   : > { %v2914_v24 = vadd.f32 %v699_v21, %v2833_v22  ;;  %v701_v25 = vpop.f32.mrb[23].mxu1 }
 0x1f8   : > { %v702_v30 = vadd.f32 %v701_v25, %v2838_v28 }
 0x1f9   : > { %831 = vrot.lane.b32.xlu1 %v696_v19, %s2477_s25  ;;  %833 = vrot.lane.b32.xlu0 %v2914_v24, %s2477_s25  ;;  %v1074_v19 = vld [vmem:[%s3435_s4 + $0x58] sm:$0xff] }
 0x1fa   : > { %v705_v31 = vpop.f32.mrb[24].mxu1 }
 0x1fb   : > { %v2921_v40 = vadd.f32 %v705_v31, %v2833_v22  ;;  %v707_v42 = vpop.f32.mrb[25].mxu1 }
 0x1fc   : > { %v708_v43 = vadd.f32 %v707_v42, %v2838_v28 }
 0x1fd   : > { %835 = vrot.lane.b32.xlu1 %v702_v30, %s2477_s25  ;;  %837 = vrot.lane.b32.xlu0 %v2921_v40, %s2477_s25 }
 0x1fe   : > { %v711_v44 = vpop.f32.mrb[26].mxu1 }
 0x1ff   : > { %v2928_v46 = vadd.f32 %v711_v44, %v2833_v22  ;;  %v713_v47 = vpop.f32.mrb[27].mxu1 }
 0x200   : > { %v714_v48 = vadd.f32 %v713_v47, %v2838_v28 }
 0x201   : > { %839 = vrot.lane.b32.xlu1 %v708_v43, %s2477_s25  ;;  %841 = vrot.lane.b32.xlu0 %v2928_v46, %s2477_s25 }
 0x202   : > { %v717_v52 = vpop.f32.mrb[28].mxu1 }
 0x203   : > { %v2947_v58 = vadd.f32 %v717_v52, %v2833_v22  ;;  %v719_v59 = vpop.f32.mrb[29].mxu1 }
 0x204   : > { %v720_v0 = vadd.f32 %v719_v59, %v2838_v28 }
 0x205   : > { %843 = vrot.lane.b32.xlu1 %v714_v48, %s2477_s25  ;;  %845 = vrot.lane.b32.xlu0 %v2947_v58, %s2477_s25 }
 0x206   : > { %v723_v2 = vpop.f32.mrb[30].mxu1 }
 0x207   : > { %v2960_v3 = vadd.f32 %v723_v2, %v2833_v22  ;;  %v725_v4 = vpop.f32.mrb[31].mxu1  ;;  %v2330_v22 = vpack.c.bf16 %v1070_v8, %v1069_v7 }
 0x208   : > { %v726_v11 = vadd.f32 %v725_v4, %v2838_v28  ;;  %v1073_v28 = vld [vmem:[%s3435_s4 + $0x50] sm:$0xff] }
 0x209   : > { %847 = vrot.lane.b32.xlu1 %v720_v0, %s2477_s25  ;;  %849 = vrot.lane.b32.xlu0 %v2960_v3, %s2477_s25  ;;  %v2338_v21 = vpack.c.bf16 %v1074_v19, %v1073_v28 }
 0x20a   : > { %2331 = vmatprep.subr.bf16.mxu1 %v2330_v22 }
 0x20b   : > { %2333 = vmatpush3.bf16.msra.mxu1 %v2330_v22 }
 0x20c   : > { %2335 = vmatprep.subr.bf16.mxu1 %v2334_v18 }
 0x20d   : > { %851 = vrot.lane.b32.xlu1 %v726_v11, %s2477_s25 }
 0x20f   : > { %2337 = vmatpush3.bf16.msra.mxu1 %v2334_v18 }
 0x210   : > { %2339 = vmatprep.subr.bf16.mxu1 %v2338_v21 }
 0x213   : > { %2341 = vmatpush3.bf16.msra.mxu1 %v2338_v21 }
 0x23f   : > { %v790_v25 = vpop.permute.xlu0 %789 }
 0x243   : > { %v794_v30 = vpop.permute.xlu1 %793  ;;  %v792_v31 = vpop.permute.xlu0 %791 }
 0x244   : > { %v853_v42 = vsel %vm288_vm0, %v790_v25, %v792_v31  ;;  %2047 = vmatprep.mubr.msk.f32.mxu0 %vm885_vm1, %v792_v31 }
 0x245   : > { %983 = vmatmul.mubr.f32.vlgmr.msra.gmra.mrb[16].mxu0 %v853_v42 }
 0x247   : > { %v796_v43 = vpop.permute.xlu1 %795  ;;  %v798_v44 = vpop.permute.xlu0 %797 }
 0x248   : > { %2048 = vmatprep.mubr.msk.f32.mxu0 %vm885_vm1, %v796_v43  ;;  %v854_v47 = vsel %vm288_vm0, %v794_v30, %v796_v43 }
 0x249   : > { %988 = vmatmul.mubr.f32.gmra.mrb[18].mxu0 %v854_v47 }
 0x24b   : > { %v800_v48 = vpop.permute.xlu1 %799  ;;  %v802_v50 = vpop.permute.xlu0 %801 }
 0x24c   : > { %2049 = vmatprep.mubr.msk.f32.mxu0 %vm885_vm1, %v800_v48  ;;  %v855_v51 = vsel %vm288_vm0, %v798_v44, %v800_v48 }
 0x24d   : > { %993 = vmatmul.mubr.f32.gmra.mrb[20].mxu0 %v855_v51 }
 0x24f   : > { %v804_v52 = vpop.permute.xlu1 %803  ;;  %v806_v54 = vpop.permute.xlu0 %805 }
 0x250   : > { %2050 = vmatprep.mubr.msk.f32.mxu0 %vm885_vm1, %v804_v52  ;;  %v856_v55 = vsel %vm288_vm0, %v802_v50, %v804_v52 }
 0x251   : > { %998 = vmatmul.mubr.f32.gmra.mrb[22].mxu0 %v856_v55 }
 0x253   : > { %v808_v56 = vpop.permute.xlu1 %807  ;;  %v810_v59 = vpop.permute.xlu0 %809 }
 0x254   : > { %2051 = vmatprep.mubr.msk.f32.mxu0 %vm885_vm1, %v808_v56  ;;  %v857_v60 = vsel %vm288_vm0, %v806_v54, %v808_v56 }
 0x255   : > { %1003 = vmatmul.mubr.f32.gmra.mrb[24].mxu0 %v857_v60 }
 0x257   : > { %v812_v62 = vpop.permute.xlu1 %811  ;;  %v814_v63 = vpop.permute.xlu0 %813 }
 0x258   : > { %2052 = vmatprep.mubr.msk.f32.mxu0 %vm885_vm1, %v812_v62  ;;  %v858_v0 = vsel %vm288_vm0, %v810_v59, %v812_v62  ;;  %v2046_v62 = vld [vmem:[%s3436_s5 + $0x2] ss:$0 sm:$0xff] }
 0x259   : > { %1008 = vmatmul.mubr.f32.gmra.mrb[26].mxu0 %v858_v0 }
 0x25b   : > { %v816_v2 = vpop.permute.xlu1 %815  ;;  %v818_v4 = vpop.permute.xlu0 %817 }
 0x25c   : > { %2053 = vmatprep.mubr.msk.f32.mxu0 %vm885_vm1, %v816_v2  ;;  %v859_v6 = vsel %vm288_vm0, %v814_v63, %v816_v2 }
 0x25d   : > { %1013 = vmatmul.mubr.f32.gmra.mrb[28].mxu0 %v859_v6 }
 0x25f   : > { %v820_v7 = vpop.permute.xlu1 %819  ;;  %v822_v8 = vpop.permute.xlu0 %821 }
 0x260   : > { %2054 = vmatprep.mubr.msk.f32.mxu0 %vm885_vm1, %v820_v7  ;;  %v860_v11 = vsel %vm288_vm0, %v818_v4, %v820_v7 }
 0x261   : > { %1018 = vmatmul.mubr.f32.gmra.mrb[30].mxu0 %v860_v11 }
 0x263   : > { %v824_v22 = vpop.permute.xlu1 %823  ;;  %v826_v12 = vpop.permute.xlu0 %825 }
 0x264   : > { %2055 = vmatprep.mubr.msk.f32.mxu0 %vm885_vm1, %v824_v22  ;;  %v861_v15 = vsel %vm288_vm0, %v822_v8, %v824_v22 }
 0x265   : > { %1023 = vmatmul.mubr.f32.gmra.mrb[32].mxu0 %v861_v15 }
 0x267   : > { %v828_v18 = vpop.permute.xlu1 %827  ;;  %v830_v28 = vpop.permute.xlu0 %829 }
 0x268   : > { %2056 = vmatprep.mubr.msk.f32.mxu0 %vm885_vm1, %v828_v18  ;;  %v862_v19 = vsel %vm288_vm0, %v826_v12, %v828_v18 }
 0x269   : > { %1028 = vmatmul.mubr.f32.gmra.mrb[34].mxu0 %v862_v19 }
 0x26b   : > { %v832_v21 = vpop.permute.xlu1 %831  ;;  %v834_v25 = vpop.permute.xlu0 %833 }
 0x26c   : > { %2057 = vmatprep.mubr.msk.f32.mxu0 %vm885_vm1, %v832_v21  ;;  %v863_v30 = vsel %vm288_vm0, %v830_v28, %v832_v21 }
 0x26d   : > { %1033 = vmatmul.mubr.f32.gmra.mrb[36].mxu0 %v863_v30 }
 0x26f   : > { %v836_v31 = vpop.permute.xlu1 %835  ;;  %v838_v42 = vpop.permute.xlu0 %837 }
 0x270   : > { %2058 = vmatprep.mubr.msk.f32.mxu0 %vm885_vm1, %v836_v31  ;;  %v864_v43 = vsel %vm288_vm0, %v834_v25, %v836_v31 }
 0x271   : > { %1038 = vmatmul.mubr.f32.gmra.mrb[38].mxu0 %v864_v43 }
 0x273   : > { %v840_v44 = vpop.permute.xlu1 %839  ;;  %v842_v47 = vpop.permute.xlu0 %841 }
 0x274   : > { %2059 = vmatprep.mubr.msk.f32.mxu0 %vm885_vm1, %v840_v44  ;;  %v865_v48 = vsel %vm288_vm0, %v838_v42, %v840_v44 }
 0x275   : > { %1043 = vmatmul.mubr.f32.gmra.mrb[40].mxu0 %v865_v48 }
 0x277   : > { %v844_v50 = vpop.permute.xlu1 %843  ;;  %v846_v51 = vpop.permute.xlu0 %845 }
 0x278   : > { %2060 = vmatprep.mubr.msk.f32.mxu0 %vm885_vm1, %v844_v50  ;;  %v866_v52 = vsel %vm288_vm0, %v842_v47, %v844_v50 }
 0x279   : > { %1048 = vmatmul.mubr.f32.gmra.mrb[42].mxu0 %v866_v52 }
 0x27b   : > { %v848_v54 = vpop.permute.xlu1 %847  ;;  %v850_v56 = vpop.permute.xlu0 %849 }
 0x27c   : > { %2061 = vmatprep.mubr.msk.f32.mxu0 %vm885_vm1, %v848_v54  ;;  %v867_v55 = vsel %vm288_vm0, %v846_v51, %v848_v54 }
 0x27d   : > { %1053 = vmatmul.mubr.f32.gmra.mrb[44].mxu0 %v867_v55 }
 0x27f   : > { %v852_v59 = vpop.permute.xlu1 %851 }
 0x280   : > { %2062 = vmatprep.mubr.msk.f32.mxu0 %vm885_vm1, %v852_v59  ;;  %v868_v60 = vsel %vm288_vm0, %v850_v56, %v852_v59 }
 0x281   : > { %1058 = vmatmul.mubr.f32.gmra.mrb[46].mxu0 %v868_v60 }
 0x318   : > { %v984_v63 = vpop.f32.mrb[16].mxu0 }
 0x319   : > { %v985_v0 = vadd.f32 %v2046_v62, %v984_v63  ;;  %v986_v2 = vpop.f32.mrb[17].mxu0 }
 0x31b   : > { %2210 = vmatprep.mubr.msk.f32.mxu1 %vm288_vm0, %v985_v0 }
 0x31c   : > { %v989_v4 = vpop.f32.mrb[18].mxu0 }
 0x31d   : > { %v990_v6 = vadd.f32 %v2046_v62, %v989_v4  ;;  %v991_v7 = vpop.f32.mrb[19].mxu0 }
 0x31f   : > { %2211 = vmatmul.mubr.msk.f32.vlgmr.msra.gmra.mrb[32].mxu1 %vm288_vm0, %v990_v6 }
 0x320   : > { %v994_v8 = vpop.f32.mrb[20].mxu0 }
 0x321   : > { %v995_v11 = vadd.f32 %v2046_v62, %v994_v8  ;;  %v996_v22 = vpop.f32.mrb[21].mxu0 }
 0x323   : > { %2213 = vmatprep.mubr.msk.f32.mxu1 %vm288_vm0, %v995_v11 }
 0x324   : > { %v999_v12 = vpop.f32.mrb[22].mxu0 }
 0x325   : > { %v1000_v15 = vadd.f32 %v2046_v62, %v999_v12  ;;  %v1001_v18 = vpop.f32.mrb[23].mxu0 }
 0x327   : > { %2214 = vmatmul.mubr.msk.f32.gmra.mrb[34].mxu1 %vm288_vm0, %v1000_v15 }
 0x328   : > { %v1004_v28 = vpop.f32.mrb[24].mxu0 }
 0x329   : > { %v1005_v19 = vadd.f32 %v2046_v62, %v1004_v28  ;;  %v1006_v21 = vpop.f32.mrb[25].mxu0 }
 0x32b   : > { %2216 = vmatprep.mubr.msk.f32.mxu1 %vm288_vm0, %v1005_v19 }
 0x32c   : > { %v1009_v25 = vpop.f32.mrb[26].mxu0 }
 0x32d   : > { %v1010_v30 = vadd.f32 %v2046_v62, %v1009_v25  ;;  %v1011_v31 = vpop.f32.mrb[27].mxu0 }
 0x32e   : > { %v2063_v31 = vld [vmem:[%s3436_s5 + $0x3] ss:$0 sm:$0xff] }
 0x32f   : > { %2217 = vmatmul.mubr.msk.f32.gmra.mrb[36].mxu1 %vm288_vm0, %v1010_v30 }
 0x330   : > { %v1014_v42 = vpop.f32.mrb[28].mxu0 }
 0x331   : > { %v1015_v43 = vadd.f32 %v2046_v62, %v1014_v42  ;;  %v1016_v44 = vpop.f32.mrb[29].mxu0 }
 0x333   : > { %2219 = vmatprep.mubr.msk.f32.mxu1 %vm288_vm0, %v1015_v43 }
 0x334   : > { %v1019_v47 = vpop.f32.mrb[30].mxu0 }
 0x335   : > { %v1020_v48 = vadd.f32 %v2046_v62, %v1019_v47  ;;  %v1021_v50 = vpop.f32.mrb[31].mxu0 }
 0x337   : > { %2220 = vmatmul.mubr.msk.f32.gmra.mrb[38].mxu1 %vm288_vm0, %v1020_v48 }
 0x338   : > { %v1024_v51 = vpop.f32.mrb[32].mxu0 }
 0x339   : > { %v1025_v52 = vadd.f32 %v2046_v62, %v1024_v51  ;;  %v1026_v54 = vpop.f32.mrb[33].mxu0 }
 0x33b   : > { %2222 = vmatprep.mubr.msk.f32.mxu1 %vm288_vm0, %v1025_v52 }
 0x33c   : > { %v1029_v55 = vpop.f32.mrb[34].mxu0 }
 0x33d   : > { %v1030_v56 = vadd.f32 %v2046_v62, %v1029_v55  ;;  %v1031_v59 = vpop.f32.mrb[35].mxu0 }
 0x33f   : > { %2223 = vmatmul.mubr.msk.f32.gmra.mrb[40].mxu1 %vm288_vm0, %v1030_v56 }
 0x340   : > { %v1034_v60 = vpop.f32.mrb[36].mxu0 }
 0x341   : > { %v1035_v63 = vadd.f32 %v2046_v62, %v1034_v60  ;;  %v1036_v0 = vpop.f32.mrb[37].mxu0 }
 0x343   : > { %2225 = vmatprep.mubr.msk.f32.mxu1 %vm288_vm0, %v1035_v63 }
 0x344   : > { %v1039_v2 = vpop.f32.mrb[38].mxu0 }
 0x345   : > { %v1040_v4 = vadd.f32 %v2046_v62, %v1039_v2  ;;  %v1041_v6 = vpop.f32.mrb[39].mxu0 }
 0x347   : > { %2226 = vmatmul.mubr.msk.f32.gmra.mrb[42].mxu1 %vm288_vm0, %v1040_v4 }
 0x348   : > { %v1044_v7 = vpop.f32.mrb[40].mxu0 }
 0x349   : > { %v1045_v8 = vadd.f32 %v2046_v62, %v1044_v7  ;;  %v1046_v11 = vpop.f32.mrb[41].mxu0 }
 0x34b   : > { %2228 = vmatprep.mubr.msk.f32.mxu1 %vm288_vm0, %v1045_v8 }
 0x34c   : > { %v1049_v22 = vpop.f32.mrb[42].mxu0 }
 0x34d   : > { %v1050_v12 = vadd.f32 %v2046_v62, %v1049_v22  ;;  %v1051_v15 = vpop.f32.mrb[43].mxu0 }
 0x34f   : > { %2229 = vmatmul.mubr.msk.f32.gmra.mrb[44].mxu1 %vm288_vm0, %v1050_v12 }
 0x350   : > { %v1054_v18 = vpop.f32.mrb[44].mxu0 }
 0x351   : > { %v1055_v28 = vadd.f32 %v2046_v62, %v1054_v18  ;;  %v1056_v19 = vpop.f32.mrb[45].mxu0 }
 0x353   : > { %2231 = vmatprep.mubr.msk.f32.mxu1 %vm288_vm0, %v1055_v28 }
 0x354   : > { %v1059_v21 = vpop.f32.mrb[46].mxu0 }
 0x355   : > { %v1060_v25 = vadd.f32 %v2046_v62, %v1059_v21  ;;  %v1061_v30 = vpop.f32.mrb[47].mxu0 }
 0x357   : > { %2232 = vmatmul.mubr.msk.f32.gmra.mrb[46].mxu1 %vm288_vm0, %v1060_v25 }
 0x3f2   : > { %v2212_v42 = vpop.f32.mrb[32].mxu1 }
 0x3f3   : > { %v3039_v43 = vadd.f32 %v2212_v42, %v2063_v31  ;;  %v1194_v44 = vpop.f32.mrb[33].mxu1 }
 0x3f4   : > { %v3041_v47 = vadd.f32 %v2063_v31, %v1194_v44 }
 0x3f5   : > { %v1277_v48 = vsel %vm1273_vm2, %v3039_v43, -inf }
 0x3f6   : > { %1278 = vmax.xlane.f32.xlu1 %v1277_v48  ;;  %v1274_v62 = vsel %vm1273_vm2, %v3041_v47, -inf }
 0x3f7   : > { %1275 = vmax.xlane.f32.xlu0 %v1274_v62 }
 0x3fa   : > { %v2215_v50 = vpop.f32.mrb[34].mxu1 }
 0x3fb   : > { %v3047_v51 = vadd.f32 %v2215_v50, %v2063_v31  ;;  %v1204_v52 = vpop.f32.mrb[35].mxu1 }
 0x3fc   : > { %v3049_v54 = vadd.f32 %v2063_v31, %v1204_v52 }
 0x3fd   : > { %v1283_v55 = vsel %vm1273_vm2, %v3047_v51, -inf }
 0x3fe   : > { %1284 = vmax.xlane.f32.xlu0 %v1283_v55  ;;  %v1280_v56 = vsel %vm1273_vm2, %v3049_v54, -inf }
 0x402   : > { %1281 = vmax.xlane.f32.xlu0 %v1280_v56  ;;  %v2218_v59 = vpop.f32.mrb[36].mxu1 }
 0x403   : > { %v3055_v60 = vadd.f32 %v2218_v59, %v2063_v31  ;;  %v1214_v63 = vpop.f32.mrb[37].mxu1 }
 0x404   : > { %v3057_v0 = vadd.f32 %v2063_v31, %v1214_v63 }
 0x405   : > { %v1289_v2 = vsel %vm1273_vm2, %v3055_v60, -inf }
 0x406   : > { %1290 = vmax.xlane.f32.xlu0 %v1289_v2  ;;  %v1286_v4 = vsel %vm1273_vm2, %v3057_v0, -inf }
 0x407   : > { %1287 = vmax.xlane.f32.xlu1 %v1286_v4 }
 0x40a   : > { %v2221_v6 = vpop.f32.mrb[38].mxu1 }
 0x40b   : > { %v3063_v7 = vadd.f32 %v2221_v6, %v2063_v31  ;;  %v1224_v8 = vpop.f32.mrb[39].mxu1 }
 0x40c   : > { %v3065_v11 = vadd.f32 %v2063_v31, %v1224_v8 }
 0x40d   : > { %v1295_v22 = vsel %vm1273_vm2, %v3063_v7, -inf }
 0x40e   : > { %1296 = vmax.xlane.f32.xlu0 %v1295_v22  ;;  %v1292_v12 = vsel %vm1273_vm2, %v3065_v11, -inf }
 0x40f   : > { %1293 = vmax.xlane.f32.xlu1 %v1292_v12 }
 0x412   : > { %v2224_v15 = vpop.f32.mrb[40].mxu1 }
 0x413   : > { %v3071_v18 = vadd.f32 %v2224_v15, %v2063_v31  ;;  %v1234_v28 = vpop.f32.mrb[41].mxu1 }
 0x414   : > { %v3073_v19 = vadd.f32 %v2063_v31, %v1234_v28 }
 0x415   : > { %v1301_v21 = vsel %vm1273_vm2, %v3071_v18, -inf }
 0x416   : > { %1302 = vmax.xlane.f32.xlu0 %v1301_v21  ;;  %v1298_v25 = vsel %vm1273_vm2, %v3073_v19, -inf }
 0x417   : > { %1299 = vmax.xlane.f32.xlu1 %v1298_v25 }
 0x41a   : > { %v2227_v30 = vpop.f32.mrb[42].mxu1 }
 0x41b   : > { %v3079_v42 = vadd.f32 %v2227_v30, %v2063_v31  ;;  %v1244_v44 = vpop.f32.mrb[43].mxu1 }
 0x41c   : > { %v3081_v48 = vadd.f32 %v2063_v31, %v1244_v44 }
 0x41d   : > { %v1307_v62 = vsel %vm1273_vm2, %v3079_v42, -inf }
 0x41e   : > { %1308 = vmax.xlane.f32.xlu0 %v1307_v62  ;;  %v1304_v50 = vsel %vm1273_vm2, %v3081_v48, -inf }
 0x41f   : > { %1305 = vmax.xlane.f32.xlu1 %v1304_v50 }
 0x422   : > { %v2230_v52 = vpop.f32.mrb[44].mxu1 }
 0x423   : > { %v3087_v55 = vadd.f32 %v2230_v52, %v2063_v31  ;;  %v1254_v56 = vpop.f32.mrb[45].mxu1 }
 0x424   : > { %v3089_v59 = vadd.f32 %v2063_v31, %v1254_v56 }
 0x425   : > { %v1313_v63 = vsel %vm1273_vm2, %v3087_v55, -inf }
 0x426   : > { %1314 = vmax.xlane.f32.xlu0 %v1313_v63  ;;  %v1310_v2 = vsel %vm1273_vm2, %v3089_v59, -inf }
 0x427   : > { %1311 = vmax.xlane.f32.xlu1 %v1310_v2 }
 0x42a   : > { %v2233_v4 = vpop.f32.mrb[46].mxu1 }
 0x42b   : > { %v3095_v6 = vadd.f32 %v2233_v4, %v2063_v31  ;;  %v1264_v8 = vpop.f32.mrb[47].mxu1 }
 0x42c   : > { %v3097_v22 = vadd.f32 %v2063_v31, %v1264_v8 }
 0x42d   : > { %v1319_v12 = vsel %vm1273_vm2, %v3095_v6, -inf }
 0x42e   : > { %1320 = vmax.xlane.f32.xlu0 %v1319_v12  ;;  %v1316_v15 = vsel %vm1273_vm2, %v3097_v22, -inf }
 0x42f   : > { %1317 = vmax.xlane.f32.xlu1 %v1316_v15 }
 0x483   : > { %v1279_v28 = vpop.xlane.xlu1 %1278 }
 0x484   : > { %v1323_v21 = vsub.f32 %v3039_v43, %v1279_v28  ;;  %v1276_v25 = vpop.xlane.xlu0 %1275 }
 0x485   : > { %v1322_v30 = vsub.f32 %v3041_v47, %v1276_v25 }
 0x486   : > { %v1340_v44 = vmul.f32 1.442695, %v1323_v21 }
 0x487   : > { %v1338_v62 = vmul.f32 1.442695, %v1322_v30 }
 0x488   : > { %2403 = vpow2.f32 %v1340_v44 }
 0x489   : > { %2405 = vpow2.f32 %v1338_v62 }
 0x48b   : > { %v1285_v31 = vpop.xlane.xlu0 %1284 }
 0x48c   : > { %v1325_v50 = vsub.f32 %v3047_v51, %v1285_v31 }
 0x48e   : > { %v1344_v52 = vmul.f32 1.442695, %v1325_v50 }
 0x48f   : > { %v1282_v56 = vpop.xlane.xlu0 %1281 }
 0x490   : > { %2407 = vpow2.f32 %v1344_v52  ;;  %v1324_v63 = vsub.f32 %v3049_v54, %v1282_v56 }
 0x492   : > { %v3107_v2 = vpop.eup %2403  ;;  %v1342_v4 = vmul.f32 1.442695, %v1324_v63 }
 0x493   : > { %v3109_v8 = vpop.eup %2405  ;;  %v1291_v43 = vpop.xlane.xlu0 %1290  ;;  %v1373_v47 = vsel %vm1273_vm2, %v3107_v2, 0.0 }
 0x494   : > { %2409 = vpow2.f32 %v1342_v4  ;;  %v1327_v12 = vsub.f32 %v3055_v60, %v1291_v43  ;;  %v1288_v15 = vpop.xlane.xlu1 %1287  ;;  %1374 = vadd.xlane.f32.xlu0 %v1373_v47  ;;  %v1370_v51 = vsel %vm1273_vm2, %v3109_v8, 0.0 }
 0x495   : > { %v1326_v28 = vsub.f32 %v3057_v0, %v1288_v15  ;;  %1371 = vadd.xlane.f32.xlu1 %v1370_v51 }
 0x496   : > { %v1348_v54 = vmul.f32 1.442695, %v1327_v12 }
 0x497   : > { %v1346_v21 = vmul.f32 1.442695, %v1326_v28 }
 0x498   : > { %2411 = vpow2.f32 %v1348_v54 }
 0x499   : > { %2413 = vpow2.f32 %v1346_v21 }
 0x49a   : > { %v3117_v25 = vpop.eup %2407 }
 0x49b   : > { %v1297_v30 = vpop.xlane.xlu0 %1296  ;;  %v1379_v44 = vsel %vm1273_vm2, %v3117_v25, 0.0 }
 0x49c   : > { %v1329_v60 = vsub.f32 %v3063_v7, %v1297_v30  ;;  %v1294_v62 = vpop.xlane.xlu1 %1293  ;;  %1380 = vadd.xlane.f32.xlu0 %v1379_v44 }
 0x49d   : > { %v1328_v31 = vsub.f32 %v3065_v11, %v1294_v62 }
 0x49e   : > { %v3123_v50 = vpop.eup %2409  ;;  %v1352_v0 = vmul.f32 1.442695, %v1329_v60 }
 0x49f   : > { %v1350_v52 = vmul.f32 1.442695, %v1328_v31  ;;  %v1376_v56 = vsel %vm1273_vm2, %v3123_v50, 0.0 }
 0x4a0   : > { %2415 = vpow2.f32 %v1352_v0  ;;  %1377 = vadd.xlane.f32.xlu1 %v1376_v56  ;;  %v2478_v0 = vmov 1  }
 0x4a1   : > { %2417 = vpow2.f32 %v1350_v52  ;;  %2358 = vset.pattern.permute.xlu1 %v2478_v0  ;;  %v2479_v52 = vmov 0  }
 0x4a2   : > { %v3127_v63 = vpop.eup %2411  ;;  %2357 = vset.pattern.permute.xlu0 %v2479_v52 }
 0x4a3   : > { %v3129_v4 = vpop.eup %2413  ;;  %v1303_v43 = vpop.xlane.xlu0 %1302  ;;  %v1385_v7 = vsel %vm1273_vm2, %v3127_v63, 0.0 }
 0x4a4   : > { %v1331_v11 = vsub.f32 %v3071_v18, %v1303_v43  ;;  %v1300_v47 = vpop.xlane.xlu1 %1299  ;;  %1386 = vadd.xlane.f32.xlu0 %v1385_v7  ;;  %v1382_v12 = vsel %vm1273_vm2, %v3129_v4, 0.0 }
 0x4a5   : > { %v1330_v15 = vsub.f32 %v3073_v19, %v1300_v47  ;;  %1383 = vadd.xlane.f32.xlu1 %v1382_v12 }
 0x4a6   : > { %v1356_v51 = vmul.f32 1.442695, %v1331_v11 }
 0x4a7   : > { %v1354_v28 = vmul.f32 1.442695, %v1330_v15 }
 0x4a8   : > { %2419 = vpow2.f32 %v1356_v51 }
 0x4a9   : > { %2421 = vpow2.f32 %v1354_v28 }
 0x4aa   : > { %v3137_v54 = vpop.eup %2415 }
 0x4ab   : > { %v3139_v21 = vpop.eup %2417  ;;  %v1309_v30 = vpop.xlane.xlu0 %1308  ;;  %v1391_v18 = vsel %vm1273_vm2, %v3137_v54, 0.0 }
 0x4ac   : > { %v1333_v44 = vsub.f32 %v3079_v42, %v1309_v30  ;;  %v1306_v60 = vpop.xlane.xlu1 %1305  ;;  %1392 = vadd.xlane.f32.xlu0 %v1391_v18  ;;  %v1388_v19 = vsel %vm1273_vm2, %v3139_v21, 0.0 }
 0x4ad   : > { %v1332_v62 = vsub.f32 %v3081_v48, %v1306_v60  ;;  %1389 = vadd.xlane.f32.xlu1 %v1388_v19 }
 0x4ae   : > { %v1360_v31 = vmul.f32 1.442695, %v1333_v44 }
 0x4af   : > { %v1358_v56 = vmul.f32 1.442695, %v1332_v62 }
 0x4b0   : > { %2423 = vpow2.f32 %v1360_v31 }
 0x4b1   : > { %2425 = vpow2.f32 %v1358_v56 }
 0x4b2   : > { %v3149_v43 = vpop.eup %2419 }
 0x4b3   : > { %v3151_v42 = vpop.eup %2421  ;;  %v1315_v7 = vpop.xlane.xlu0 %1314  ;;  %v1397_v11 = vsel %vm1273_vm2, %v3149_v43, 0.0 }
 0x4b4   : > { %v1335_v48 = vsub.f32 %v3087_v55, %v1315_v7  ;;  %v1312_v47 = vpop.xlane.xlu1 %1311  ;;  %1398 = vadd.xlane.f32.xlu0 %v1397_v11  ;;  %v1394_v12 = vsel %vm1273_vm2, %v3151_v42, 0.0 }
 0x4b5   : > { %v1334_v15 = vsub.f32 %v3089_v59, %v1312_v47  ;;  %1395 = vadd.xlane.f32.xlu1 %v1394_v12 }
 0x4b6   : > { %v1364_v51 = vmul.f32 1.442695, %v1335_v48 }
 0x4b7   : > { %v1362_v28 = vmul.f32 1.442695, %v1334_v15 }
 0x4b8   : > { %2427 = vpow2.f32 %v1364_v51 }
 0x4b9   : > { %2429 = vpow2.f32 %v1362_v28 }
 0x4ba   : > { %v3159_v30 = vpop.eup %2423 }
 0x4bb   : > { %v3161_v18 = vpop.eup %2425  ;;  %v1321_v44 = vpop.xlane.xlu0 %1320  ;;  %v1403_v55 = vsel %vm1273_vm2, %v3159_v30, 0.0 }
 0x4bc   : > { %v1337_v60 = vsub.f32 %v3095_v6, %v1321_v44  ;;  %v1318_v19 = vpop.xlane.xlu1 %1317  ;;  %1404 = vadd.xlane.f32.xlu0 %v1403_v55  ;;  %v1400_v59 = vsel %vm1273_vm2, %v3161_v18, 0.0 }
 0x4bd   : > { %v1336_v62 = vsub.f32 %v3097_v22, %v1318_v19  ;;  %1401 = vadd.xlane.f32.xlu1 %v1400_v59 }
 0x4be   : > { %v1368_v31 = vmul.f32 1.442695, %v1337_v60 }
 0x4bf   : > { %v1366_v56 = vmul.f32 1.442695, %v1336_v62 }
 0x4c0   : > { %2431 = vpow2.f32 %v1368_v31 }
 0x4c1   : > { %2433 = vpow2.f32 %v1366_v56  ;;  %v2480_v56 = vmov 2  }
 0x4c2   : > { %v3169_v7 = vpop.eup %2427 }
 0x4c3   : > { %v3171_v11 = vpop.eup %2429  ;;  %v1409_v48 = vsel %vm1273_vm2, %v3169_v7, 0.0 }
 0x4c4   : > { %1410 = vadd.xlane.f32.xlu0 %v1409_v48  ;;  %v1406_v6 = vsel %vm1273_vm2, %v3171_v11, 0.0 }
 0x4c5   : > { %1407 = vadd.xlane.f32.xlu1 %v1406_v6 }
 0x4ca   : > { %v3177_v47 = vpop.eup %2431 }
 0x4cb   : > { %v3179_v22 = vpop.eup %2433  ;;  %v1415_v12 = vsel %vm1273_vm2, %v3177_v47, 0.0 }
 0x4cc   : > { %1416 = vadd.xlane.f32.xlu0 %v1415_v12  ;;  %v1412_v15 = vsel %vm1273_vm2, %v3179_v22, 0.0 }
 0x4cd   : > { %1413 = vadd.xlane.f32.xlu1 %v1412_v15 }
 0x521   : > { %v1375_v51 = vpop.xlane.xlu0 %1374 }
 0x522   : > { %2435 = vrcp.f32 %v1375_v51  ;;  %v1372_v28 = vpop.xlane.xlu1 %1371 }
 0x523   : > { %2437 = vrcp.f32 %v1372_v28 }
 0x529   : > { %v1381_v44 = vpop.xlane.xlu0 %1380 }
 0x52a   : > { %2439 = vrcp.f32 %v1381_v44 }
 0x52c   : > { %v2436_v55 = vpop.eup %2435 }
 0x52d   : > { %v1435_v60 = vmul.f32 %v2436_v55, %v3107_v2  ;;  %v1378_v19 = vpop.xlane.xlu1 %1377  ;;  %v2438_v59 = vpop.eup %2437 }
 0x52e   : > { %v1434_v31 = vmul.f32 %v2438_v59, %v3109_v8 }
 0x52f   : > { %1551 = vperm.xlu1 %2358, %v1435_v60   ;;  %1457 = vperm.xlu0 %2357, %v1435_v60  }
 0x531   : > { %v1387_v62 = vpop.xlane.xlu0 %1386 }
 0x532   : > { %2441 = vrcp.f32 %v1387_v62  ;;  %v1384_v48 = vpop.xlane.xlu1 %1383 }
 0x533   : > { %2360 = vset.pattern.permute.xlu1 %v2479_v52  ;;  %2359 = vset.pattern.permute.xlu0 %v2480_v56  ;;  %2443 = vrcp.f32 %v1384_v48 }
 0x534   : > { %1452 = vperm.xlu1 %2360, %v1434_v31   ;;  %1711 = vperm.xlu0 %2359, %v1435_v60   ;;  %v2440_v6 = vpop.eup %2439  ;;  %2445 = vrcp.f32 %v1378_v19 }
 0x535   : > { %v1437_v8 = vmul.f32 %v2440_v6, %v3117_v25 }
 0x538   : > { %2362 = vset.pattern.permute.xlu1 %v2480_v56  ;;  %2361 = vset.pattern.permute.xlu0 %v2478_v0 }
 0x539   : > { %1707 = vperm.xlu1 %2362, %v1434_v31   ;;  %1547 = vperm.xlu0 %2361, %v1434_v31   ;;  %v1393_v2 = vpop.xlane.xlu0 %1392 }
 0x53a   : > { %2447 = vrcp.f32 %v1393_v2  ;;  %v1390_v15 = vpop.xlane.xlu1 %1389 }
 0x53b   : > { %2449 = vrcp.f32 %v1390_v15 }
 0x53c   : > { %v2442_v12 = vpop.eup %2441 }
 0x53d   : > { %2363 = vset.pattern.permute.xlu1 %v2479_v52  ;;  %1559 = vperm.xlu0 %2361, %v1437_v8   ;;  %v1439_v51 = vmul.f32 %v2442_v12, %v3127_v63  ;;  %v2444_v28 = vpop.eup %2443 }
 0x53e   : > { %1467 = vperm.xlu1 %2363, %v1437_v8   ;;  %v2446_v44 = vpop.eup %2445  ;;  %v1438_v60 = vmul.f32 %v2444_v28, %v3129_v4 }
 0x53f   : > { %v1436_v19 = vmul.f32 %v2446_v44, %v3123_v50 }
 0x541   : > { %1567 = vperm.xlu0 %2361, %v1439_v51   ;;  %v1399_v55 = vpop.xlane.xlu0 %1398 }
 0x542   : > { %2364 = vset.pattern.permute.xlu1 %v2480_v56  ;;  %2451 = vrcp.f32 %v1399_v55  ;;  %v1396_v63 = vpop.xlane.xlu1 %1395 }
 0x543   : > { %1719 = vperm.xlu1 %2364, %v1437_v8   ;;  %2453 = vrcp.f32 %v1396_v63 }
 0x544   : > { %v2448_v25 = vpop.eup %2447 }
 0x545   : > { %2372 = vset.pattern.permute.xlu0 %v2480_v56  ;;  %v1441_v59 = vmul.f32 %v2448_v25, %v3137_v54  ;;  %v2450_v62 = vpop.eup %2449 }
 0x546   : > { %1723 = vperm.xlu0 %2372, %v1438_v60   ;;  %v1440_v31 = vmul.f32 %v2450_v62, %v3139_v21 }
 0x547   : > { %2365 = vset.pattern.permute.xlu1 %v2479_v52 }
 0x548   : > { %1462 = vperm.xlu1 %2365, %v1436_v19  }
 0x549   : > { %v1405_v4 = vpop.xlane.xlu0 %1404 }
 0x54a   : > { %2374 = vset.pattern.permute.xlu0 %v2478_v0  ;;  %2455 = vrcp.f32 %v1405_v4  ;;  %v1402_v48 = vpop.xlane.xlu1 %1401 }
 0x54b   : > { %1575 = vperm.xlu0 %2374, %v1441_v59   ;;  %2457 = vrcp.f32 %v1402_v48 }
 0x54c   : > { %2366 = vset.pattern.permute.xlu1 %v2478_v0  ;;  %v2452_v50 = vpop.eup %2451 }
 0x54d   : > { %1555 = vperm.xlu1 %2366, %v1436_v19   ;;  %v1443_v54 = vmul.f32 %v2452_v50, %v3149_v43  ;;  %v2454_v6 = vpop.eup %2453 }
 0x54e   : > { %v1442_v21 = vmul.f32 %v2454_v6, %v3151_v42 }
 0x54f   : > { %2378 = vset.pattern.permute.xlu0 %v2480_v56 }
 0x550   : > { %1731 = vperm.xlu0 %2378, %v1440_v31  }
 0x551   : > { %2367 = vset.pattern.permute.xlu1 %v2480_v56  ;;  %v1411_v8 = vpop.xlane.xlu0 %1410 }
 0x552   : > { %1715 = vperm.xlu1 %2367, %v1436_v19   ;;  %2459 = vrcp.f32 %v1411_v8  ;;  %v1408_v15 = vpop.xlane.xlu1 %1407 }
 0x553   : > { %2461 = vrcp.f32 %v1408_v15 }
 0x554   : > { %2380 = vset.pattern.permute.xlu0 %v2478_v0  ;;  %v2456_v2 = vpop.eup %2455 }
 0x555   : > { %1583 = vperm.xlu0 %2380, %v1443_v54   ;;  %v1445_v43 = vmul.f32 %v2456_v2, %v3159_v30  ;;  %v2458_v12 = vpop.eup %2457 }
 0x556   : > { %2368 = vset.pattern.permute.xlu1 %v2479_v52  ;;  %v1444_v42 = vmul.f32 %v2458_v12, %v3161_v18 }
 0x557   : > { %1477 = vperm.xlu1 %2368, %v1439_v51  }
 0x559   : > { %2384 = vset.pattern.permute.xlu0 %v2480_v56 }
 0x55a   : > { %1739 = vperm.xlu0 %2384, %v1442_v21   ;;  %v1414_v44 = vpop.xlane.xlu1 %1413 }
 0x55b   : > { %2369 = vset.pattern.permute.xlu1 %v2480_v56 }
 0x55c   : > { %1727 = vperm.xlu1 %2369, %v1439_v51   ;;  %v2460_v30 = vpop.eup %2459  ;;  %v1417_v51 = vpop.xlane.xlu0 %1416 }
 0x55d   : > { %v1447_v28 = vmul.f32 %v2460_v30, %v3169_v7  ;;  %v2462_v18 = vpop.eup %2461  ;;  %2463 = vrcp.f32 %v1417_v51 }
 0x55e   : > { %2386 = vset.pattern.permute.xlu0 %v2478_v0  ;;  %v1446_v55 = vmul.f32 %v2462_v18, %v3171_v11  ;;  %2465 = vrcp.f32 %v1414_v44 }
 0x55f   : > { %1591 = vperm.xlu0 %2386, %v1445_v43  }
 0x560   : > { %2370 = vset.pattern.permute.xlu1 %v2479_v52 }
 0x561   : > { %1472 = vperm.xlu1 %2370, %v1438_v60  }
 0x563   : > { %2388 = vset.pattern.permute.xlu0 %v2479_v52 }
 0x564   : > { %1502 = vperm.xlu0 %2388, %v1444_v42  }
 0x565   : > { %2371 = vset.pattern.permute.xlu1 %v2478_v0 }
 0x566   : > { %1563 = vperm.xlu1 %2371, %v1438_v60  }
 0x567   : > { %v2464_v7 = vpop.eup %2463 }
 0x568   : > { %2390 = vset.pattern.permute.xlu0 %v2480_v56  ;;  %v1449_v60 = vmul.f32 %v2464_v7, %v3177_v47  ;;  %v2466_v25 = vpop.eup %2465 }
 0x569   : > { %1747 = vperm.xlu0 %2390, %v1444_v42   ;;  %v1448_v11 = vmul.f32 %v2466_v25, %v3179_v22 }
 0x56a   : > { %2373 = vset.pattern.permute.xlu1 %v2479_v52 }
 0x56b   : > { %1487 = vperm.xlu1 %2373, %v1441_v59  }
 0x56d   : > { %2392 = vset.pattern.permute.xlu0 %v2478_v0 }
 0x56e   : > { %1599 = vperm.xlu0 %2392, %v1447_v28  }
 0x56f   : > { %2375 = vset.pattern.permute.xlu1 %v2480_v56 }
 0x570   : > { %1735 = vperm.xlu1 %2375, %v1441_v59  }
 0x572   : > { %2394 = vset.pattern.permute.xlu0 %v2479_v52 }
 0x573   : > { %1512 = vperm.xlu0 %2394, %v1446_v55  }
 0x574   : > { %2376 = vset.pattern.permute.xlu1 %v2479_v52 }
 0x575   : > { %1482 = vperm.xlu1 %2376, %v1440_v31  }
 0x577   : > { %2396 = vset.pattern.permute.xlu0 %v2480_v56 }
 0x578   : > { %1755 = vperm.xlu0 %2396, %v1446_v55  }
 0x579   : > { %2377 = vset.pattern.permute.xlu1 %v2478_v0 }
 0x57a   : > { %1571 = vperm.xlu1 %2377, %v1440_v31  }
 0x57c   : > { %2398 = vset.pattern.permute.xlu0 %v2478_v0 }
 0x57d   : > { %1607 = vperm.xlu0 %2398, %v1449_v60  }
 0x57e   : > { %2379 = vset.pattern.permute.xlu1 %v2479_v52 }
 0x57f   : > { %1497 = vperm.xlu1 %2379, %v1443_v54  }
 0x581   : > { %2399 = vset.pattern.permute.xlu0 %v2479_v52 }
 0x582   : > { %1522 = vperm.xlu0 %2399, %v1448_v11  }
 0x583   : > { %2381 = vset.pattern.permute.xlu1 %v2480_v56 }
 0x584   : > { %1743 = vperm.xlu1 %2381, %v1443_v54  }
 0x586   : > { %2402 = vset.pattern.permute.xlu0 %v2480_v56 }
 0x587   : > { %1763 = vperm.xlu0 %2402, %v1448_v11  }
 0x588   : > { %2382 = vset.pattern.permute.xlu1 %v2479_v52 }
 0x589   : > { %1492 = vperm.xlu1 %2382, %v1442_v21  }
 0x58d   : > { %2383 = vset.pattern.permute.xlu1 %v2478_v0 }
 0x58e   : > { %1579 = vperm.xlu1 %2383, %v1442_v21  }
 0x592   : > { %2385 = vset.pattern.permute.xlu1 %v2479_v52 }
 0x593   : > { %1507 = vperm.xlu1 %2385, %v1445_v43  }
 0x597   : > { %2387 = vset.pattern.permute.xlu1 %v2480_v56 }
 0x598   : > { %1751 = vperm.xlu1 %2387, %v1445_v43  }
 0x59c   : > { %2389 = vset.pattern.permute.xlu1 %v2478_v0 }
 0x59d   : > { %1587 = vperm.xlu1 %2389, %v1444_v42  }
 0x5a1   : > { %2391 = vset.pattern.permute.xlu1 %v2479_v52 }
 0x5a2   : > { %1517 = vperm.xlu1 %2391, %v1447_v28  }
 0x5a6   : > { %2393 = vset.pattern.permute.xlu1 %v2480_v56 }
 0x5a7   : > { %1759 = vperm.xlu1 %2393, %v1447_v28  }
 0x5ab   : > { %2395 = vset.pattern.permute.xlu1 %v2478_v0 }
 0x5ac   : > { %1595 = vperm.xlu1 %2395, %v1446_v55  }
 0x5ae   : > { %v1552_v47 = vpop.permute.xlu1 %1551  ;;  %v3242_v22 = vpop.permute.xlu0 %1457 }
 0x5af   : > { %v1611_v31 = vmul.f32 %v1552_v47, %v2684_v13 }
 0x5b0   : > { %2397 = vset.pattern.permute.xlu1 %v2479_v52 }
 0x5b1   : > { %1527 = vperm.xlu1 %2397, %v1449_v60  }
 0x5b3   : > { %v3245_v19 = vpop.permute.xlu1 %1452  ;;  %v1712_v63 = vpop.permute.xlu0 %1711 }
 0x5b5   : > { %2400 = vset.pattern.permute.xlu1 %v2478_v0  ;;  %v1771_v0 = vmul.f32 %v1712_v63, %v2684_v13 }
 0x5b6   : > { %1603 = vperm.xlu1 %2400, %v1448_v11  }
 0x5b8   : > { %v1708_v59 = vpop.permute.xlu1 %1707  ;;  %v1548_v62 = vpop.permute.xlu0 %1547 }
 0x5b9   : > { %v1610_v4 = vmul.f32 %v1548_v62, %v2679_v10  ;;  %v1770_v52 = vmul.f32 %v1708_v59, %v2679_v10 }
 0x5ba   : > { %2401 = vset.pattern.permute.xlu1 %v2480_v56 }
 0x5bb   : > { %1767 = vperm.xlu1 %2401, %v1449_v60   ;;  %1642 = vrot.lane.b32.xlu0 %v1610_v4, %s2477_s25 }
 0x5bc   : > { %v1560_v48 = vpop.permute.xlu0 %1559 }
 0x5bd   : > { %v3253_v50 = vpop.permute.xlu1 %1467  ;;  %v1613_v56 = vmul.f32 %v1560_v48, %v2691_v17 }
 0x5bf   : > { %1644 = vrot.lane.b32.xlu1 %v1611_v31, %s2477_s25  ;;  %1802 = vrot.lane.b32.xlu0 %v1770_v52, %s2481_s12 }
 0x5c0   : > { %v1568_v2 = vpop.permute.xlu0 %1567 }
 0x5c1   : > { %v1615_v43 = vmul.f32 %v1568_v2, %v2701_v23 }
 0x5c2   : > { %v1720_v54 = vpop.permute.xlu1 %1719 }
 0x5c3   : > { %1804 = vrot.lane.b32.xlu1 %v1771_v0, %s2481_s12  ;;  %v1773_v21 = vmul.f32 %v1720_v54, %v2691_v17 }
 0x5c5   : > { %v1724_v51 = vpop.permute.xlu0 %1723 }
 0x5c6   : > { %v1774_v47 = vmul.f32 %v1724_v51, %v2698_v20 }
 0x5c7   : > { %v3260_v6 = vpop.permute.xlu1 %1462  ;;  %1648 = vrot.lane.b32.xlu1 %v1613_v56, %s2477_s25 }
 0x5ca   : > { %v1576_v44 = vpop.permute.xlu0 %1575 }
 0x5cb   : > { %1808 = vrot.lane.b32.xlu1 %v1773_v21, %s2481_s12  ;;  %v1617_v55 = vmul.f32 %v1576_v44, %v2711_v29 }
 0x5cc   : > { %v1556_v8 = vpop.permute.xlu1 %1555 }
 0x5cd   : > { %v1612_v12 = vmul.f32 %v1556_v8, %v2688_v14 }
 0x5cf   : > { %1646 = vrot.lane.b32.xlu0 %v1612_v12, %s2477_s25  ;;  %1652 = vrot.lane.b32.xlu1 %v1615_v43, %s2477_s25  ;;  %v1732_v11 = vpop.permute.xlu0 %1731 }
 0x5d0   : > { %v1776_v21 = vmul.f32 %v1732_v11, %v2708_v26 }
 0x5d1   : > { %v1716_v15 = vpop.permute.xlu1 %1715 }
 0x5d2   : > { %v1772_v42 = vmul.f32 %v1716_v15, %v2688_v14 }
 0x5d4   : > { %1806 = vrot.lane.b32.xlu0 %v1772_v42, %s2481_s12  ;;  %v1584_v59 = vpop.permute.xlu0 %1583 }
 0x5d5   : > { %v1619_v52 = vmul.f32 %v1584_v59, %v2721_v33 }
 0x5d6   : > { %v3271_v30 = vpop.permute.xlu1 %1477 }
 0x5d9   : > { %v1740_v31 = vpop.permute.xlu0 %1739 }
 0x5db   : > { %v1728_v28 = vpop.permute.xlu1 %1727 }
 0x5dc   : > { %v1775_v18 = vmul.f32 %v1728_v28, %v2701_v23 }
 0x5de   : > { %1812 = vrot.lane.b32.xlu1 %v1775_v18, %s2481_s12  ;;  %v1592_v48 = vpop.permute.xlu0 %1591 }
 0x5df   : > { %v1621_v42 = vmul.f32 %v1592_v48, %v2731_v35 }
 0x5e0   : > { %v3276_v7 = vpop.permute.xlu1 %1472 }
 0x5e2   : > { %1656 = vrot.lane.b32.xlu1 %v1617_v55, %s2477_s25 }
 0x5e3   : > { %v3296_v8 = vpop.permute.xlu0 %1502 }
 0x5e5   : > { %v1564_v60 = vpop.permute.xlu1 %1563 }
 0x5e6   : > { %v1614_v25 = vmul.f32 %v1564_v60, %v2698_v20  ;;  %v1778_v60 = vmul.f32 %v1740_v31, %v2718_v32 }
 0x5e8   : > { %1650 = vrot.lane.b32.xlu0 %v1614_v25, %s2477_s25  ;;  %v1748_v15 = vpop.permute.xlu0 %1747 }
 0x5e9   : > { %v1780_v31 = vmul.f32 %v1748_v15, %v2728_v34 }
 0x5ea   : > { %v3282_v63 = vpop.permute.xlu1 %1487 }
 0x5ec   : > { %1810 = vrot.lane.b32.xlu0 %v1774_v47, %s2481_s12 }
 0x5ed   : > { %v1600_v28 = vpop.permute.xlu0 %1599 }
 0x5ef   : > { %v1736_v62 = vpop.permute.xlu1 %1735 }
 0x5f0   : > { %v1777_v4 = vmul.f32 %v1736_v62, %v2711_v29  ;;  %v1623_v62 = vmul.f32 %v1600_v28, %v2741_v37 }
 0x5f2   : > { %1816 = vrot.lane.b32.xlu1 %v1777_v4, %s2481_s12  ;;  %v3307_v55 = vpop.permute.xlu0 %1512 }
 0x5f4   : > { %v3288_v0 = vpop.permute.xlu1 %1482 }
 0x5f6   : > { %1660 = vrot.lane.b32.xlu1 %v1619_v52, %s2477_s25 }
 0x5f7   : > { %v1756_v11 = vpop.permute.xlu0 %1755 }
 0x5f9   : > { %v1572_v54 = vpop.permute.xlu1 %1571 }
 0x5fa   : > { %v1616_v56 = vmul.f32 %v1572_v54, %v2708_v26 }
 0x5fc   : > { %1654 = vrot.lane.b32.xlu0 %v1616_v56, %s2477_s25  ;;  %v1608_v52 = vpop.permute.xlu0 %1607 }
 0x5fe   : > { %v3294_v2 = vpop.permute.xlu1 %1497 }
 0x600   : > { %1814 = vrot.lane.b32.xlu0 %v1776_v21, %s2481_s12 }
 0x601   : > { %v3322_v56 = vpop.permute.xlu0 %1522 }
 0x603   : > { %v1744_v43 = vpop.permute.xlu1 %1743 }
 0x604   : > { %v1779_v12 = vmul.f32 %v1744_v43, %v2721_v33 }
 0x606   : > { %1820 = vrot.lane.b32.xlu1 %v1779_v12, %s2481_s12  ;;  %v1764_v12 = vpop.permute.xlu0 %1763 }
 0x608   : > { %v3302_v51 = vpop.permute.xlu1 %1492 }
 0x60a   : > { %1664 = vrot.lane.b32.xlu1 %v1621_v42, %s2477_s25  ;;  %v1625_v42 = vmul.f32 %v1608_v52, %v2751_v39  ;;  %v1866_v52 = vmul.f32 0.5, %v2836_v27  ;;  %v1784_v27 = vmul.f32 %v1764_v12, %v2748_v38  ;;  %v1867_v12 = vmul.f32 0.5, %v2844_v41 }
 0x60d   : > { %v1580_v18 = vpop.permute.xlu1 %1579 }
 0x60e   : > { %v1618_v44 = vmul.f32 %v1580_v18, %v2718_v32 }
 0x610   : > { %1658 = vrot.lane.b32.xlu0 %v1618_v44, %s2477_s25  ;;  %v1530_v44 = vmul.f32 %v3245_v19, %v2679_v10 }
 0x612   : > { %v3310_v25 = vpop.permute.xlu1 %1507 }
 0x614   : > { %1818 = vrot.lane.b32.xlu0 %v1778_v60, %s2481_s12  ;;  %v1782_v60 = vmul.f32 %v1756_v11, %v2738_v36 }
 0x617   : > { %v1752_v47 = vpop.permute.xlu1 %1751 }
 0x618   : > { %v1781_v59 = vmul.f32 %v1752_v47, %v2731_v35 }
 0x61a   : > { %1824 = vrot.lane.b32.xlu1 %v1781_v59, %s2481_s12 }
 0x61c   : > { %v1588_v4 = vpop.permute.xlu1 %1587 }
 0x61d   : > { %v1620_v48 = vmul.f32 %v1588_v4, %v2728_v34 }
 0x61e   : > { %1668 = vrot.lane.b32.xlu1 %v1623_v62, %s2477_s25 }
 0x61f   : > { %1662 = vrot.lane.b32.xlu0 %v1620_v48, %s2477_s25 }
 0x621   : > { %v3320_v54 = vpop.permute.xlu1 %1517 }
 0x623   : > { %1822 = vrot.lane.b32.xlu0 %v1780_v31, %s2481_s12 }
 0x626   : > { %v1760_v21 = vpop.permute.xlu1 %1759 }
 0x627   : > { %v1783_v43 = vmul.f32 %v1760_v21, %v2741_v37 }
 0x629   : > { %1828 = vrot.lane.b32.xlu1 %v1783_v43, %s2481_s12 }
 0x62b   : > { %v1596_v28 = vpop.permute.xlu1 %1595 }
 0x62c   : > { %v1622_v18 = vmul.f32 %v1596_v28, %v2738_v36  ;;  %v1531_v28 = vmul.f32 %v3242_v22, %v2684_v13  ;;  %v1868_v22 = vmul.f32 0.5, %v2851_v45  ;;  %v1535_v45 = vmul.f32 %v3271_v30, %v2701_v23 }
 0x62d   : > { %1672 = vrot.lane.b32.xlu1 %v1625_v42, %s2477_s25  ;;  %v1643_v15 = vpop.permute.xlu0 %1642 }
 0x62e   : > { %1666 = vrot.lane.b32.xlu0 %v1622_v18, %s2477_s25  ;;  %v1690_v47 = vadd.f32 %v1643_v15, %v1530_v44 }
 0x630   : > { %v3334_v59 = vpop.permute.xlu1 %1527 }
 0x631   : > { %v1803_v62 = vpop.permute.xlu0 %1802 }
 0x632   : > { %v1850_v4 = vadd.f32 %v1803_v62, %v1690_v47  ;;  %1826 = vrot.lane.b32.xlu0 %v1782_v60, %s2481_s12  ;;  %v1532_v60 = vmul.f32 %v3260_v6, %v2688_v14 }
 0x634   : > { %v1882_v48 = vmul.f32 0.5, %v1850_v4 }
 0x635   : > { %v1604_v31 = vpop.permute.xlu1 %1603 }
 0x636   : > { %v1898_v10 = vadd.f32 %v1882_v48, %v1866_v52  ;;  %v1624_v19 = vmul.f32 %v1604_v31, %v2748_v38  ;;  %v1533_v31 = vmul.f32 %v3253_v50, %v2691_v17 }
 0x638   : > { %v1915_v11 = vsel %vm1914_vm3, %v1898_v10, 0.0  ;;  %1670 = vrot.lane.b32.xlu0 %v1624_v19, %s2477_s25 }
 0x639   : > { %1931 = vst [vmem:[%s3343_s14] sm:$0xff] %v1915_v11 }
 0x63a   : > { %v1768_v21 = vpop.permute.xlu1 %1767 }
 0x63b   : > { %v1785_v43 = vmul.f32 %v1768_v21, %v2751_v39  ;;  %v1869_v21 = vmul.f32 0.5, %v2858_v49 }
 0x63c   : > { %1830 = vrot.lane.b32.xlu0 %v1784_v27, %s2481_s12 }
 0x63d   : > { %1832 = vrot.lane.b32.xlu1 %v1785_v43, %s2481_s12 }
 0x63e   : > { %v1645_v42 = vpop.permute.xlu1 %1644 }
 0x63f   : > { %v1691_v18 = vadd.f32 %v1645_v42, %v1531_v28 }
 0x641   : > { %v1647_v15 = vpop.permute.xlu0 %1646 }
 0x642   : > { %v1805_v44 = vpop.permute.xlu1 %1804  ;;  %v1692_v62 = vadd.f32 %v1647_v15, %v1532_v60  ;;  %v1871_v60 = vmul.f32 0.5, %v2872_v57  ;;  %v1537_v57 = vmul.f32 %v3282_v63, %v2711_v29  ;;  %v1536_v29 = vmul.f32 %v3288_v0, %v2708_v26 }
 0x643   : > { %v1851_v47 = vadd.f32 %v1805_v44, %v1691_v18  ;;  %v1875_v26 = vmul.f32 0.5, %v2900_v9  ;;  %v1541_v9 = vmul.f32 %v3310_v25, %v2731_v35 }
 0x645   : > { %v1883_v4 = vmul.f32 0.5, %v1851_v47 }
 0x646   : > { %v1649_v52 = vpop.permute.xlu1 %1648  ;;  %v1807_v48 = vpop.permute.xlu0 %1806 }
 0x647   : > { %v1899_v10 = vadd.f32 %v1883_v4, %v1867_v12  ;;  %v1852_v13 = vadd.f32 %v1807_v48, %v1692_v62  ;;  %v1693_v11 = vadd.f32 %v1649_v52, %v1533_v31  ;;  %v1534_v4 = vmul.f32 %v3276_v7, %v2698_v20 }
 0x648   : > { %v1870_v31 = vmul.f32 0.5, %v2865_v53  ;;  %v1873_v20 = vmul.f32 0.5, %v2886_v1  ;;  %v1539_v1 = vmul.f32 %v3294_v2, %v2721_v33  ;;  %v1538_v33 = vmul.f32 %v3302_v51, %v2718_v32 }
 0x649   : > { %v1916_v19 = vsel %vm1914_vm3, %v1899_v10, 0.0  ;;  %v1884_v14 = vmul.f32 0.5, %v1852_v13  ;;  %v1877_v32 = vmul.f32 0.5, %v2914_v24  ;;  %v1543_v24 = vmul.f32 %v3320_v54, %v2741_v37 }
 0x64a   : > { %1932 = vst [vmem:[%s3343_s14 + $0x8] sm:$0xff] %v1916_v19  ;;  %v1809_v6 = vpop.permute.xlu1 %1808 }
 0x64b   : > { %v1900_v41 = vadd.f32 %v1884_v14, %v1868_v22  ;;  %v1853_v27 = vadd.f32 %v1809_v6, %v1693_v11 }
 0x64d   : > { %v1917_v43 = vsel %vm1914_vm3, %v1900_v41, 0.0  ;;  %v1885_v42 = vmul.f32 0.5, %v1853_v27 }
 0x64e   : > { %1933 = vst [vmem:[%s3343_s14 + $0x10] sm:$0xff] %v1917_v43  ;;  %v1653_v17 = vpop.permute.xlu1 %1652 }
 0x64f   : > { %v1901_v50 = vadd.f32 %v1885_v42, %v1869_v21  ;;  %v1695_v18 = vadd.f32 %v1653_v17, %v1535_v45  ;;  %v1872_v42 = vmul.f32 0.5, %v2879_v61 }
 0x651   : > { %v1918_v28 = vsel %vm1914_vm3, %v1901_v50, 0.0 }
 0x652   : > { %1934 = vst [vmem:[%s3343_s14 + $0x18] sm:$0xff] %v1918_v28  ;;  %v1813_v15 = vpop.permute.xlu1 %1812 }
 0x653   : > { %v1855_v44 = vadd.f32 %v1813_v15, %v1695_v18 }
 0x655   : > { %v1887_v47 = vmul.f32 0.5, %v1855_v44 }
 0x656   : > { %v1657_v48 = vpop.permute.xlu1 %1656 }
 0x657   : > { %v1903_v49 = vadd.f32 %v1887_v47, %v1871_v60  ;;  %v1697_v13 = vadd.f32 %v1657_v48, %v1537_v57 }
 0x659   : > { %v1920_v12 = vsel %vm1914_vm3, %v1903_v49, 0.0 }
 0x65a   : > { %1936 = vst [vmem:[%s3343_s14 + $0x28] sm:$0xff] %v1920_v12  ;;  %v1651_v62 = vpop.permute.xlu0 %1650 }
 0x65b   : > { %v1694_v23 = vadd.f32 %v1651_v62, %v1534_v4  ;;  %v1874_v62 = vmul.f32 0.5, %v2893_v5  ;;  %v1540_v5 = vmul.f32 %v3296_v8, %v2728_v34  ;;  %v1879_v8 = vmul.f32 0.5, %v2928_v46 }
 0x65c   : > { %v1544_v46 = vmul.f32 %v3322_v56, %v2748_v38  ;;  %v1881_v38 = vmul.f32 0.5, %v2960_v3 }
 0x65e   : > { %v1811_v30 = vpop.permute.xlu0 %1810 }
 0x65f   : > { %v1854_v52 = vadd.f32 %v1811_v30, %v1694_v23 }
 0x661   : > { %v1886_v10 = vmul.f32 0.5, %v1854_v52 }
 0x663   : > { %v1902_v22 = vadd.f32 %v1886_v10, %v1870_v31 }
 0x664   : > { %v1817_v19 = vpop.permute.xlu1 %1816 }
 0x665   : > { %v1919_v11 = vsel %vm1914_vm3, %v1902_v22, 0.0  ;;  %v1857_v14 = vadd.f32 %v1817_v19, %v1697_v13 }
 0x666   : > { %1935 = vst [vmem:[%s3343_s14 + $0x20] sm:$0xff] %v1919_v11  ;;  %v1876_v11 = vmul.f32 0.5, %v2907_v16  ;;  %v1542_v16 = vmul.f32 %v3307_v55, %v2738_v36  ;;  %v1545_v36 = vmul.f32 %v3334_v59, %v2751_v39 }
 0x667   : > { %v1889_v7 = vmul.f32 0.5, %v1857_v14 }
 0x668   : > { %v1661_v43 = vpop.permute.xlu1 %1660 }
 0x669   : > { %v1905_v6 = vadd.f32 %v1889_v7, %v1873_v20  ;;  %v1699_v45 = vadd.f32 %v1661_v43, %v1539_v1  ;;  %v1878_v43 = vmul.f32 0.5, %v2921_v40 }
 0x66b   : > { %v1922_v41 = vsel %vm1914_vm3, %v1905_v6, 0.0 }
 0x66c   : > { %1938 = vst [vmem:[%s3343_s14 + $0x38] sm:$0xff] %v1922_v41 }
 0x66e   : > { %v1655_v53 = vpop.permute.xlu0 %1654 }
 0x66f   : > { %v1696_v63 = vadd.f32 %v1655_v53, %v1536_v29 }
 0x672   : > { %v1815_v27 = vpop.permute.xlu0 %1814 }
 0x673   : > { %v1856_v21 = vadd.f32 %v1815_v27, %v1696_v63 }
 0x675   : > { %v1888_v17 = vmul.f32 0.5, %v1856_v21 }
 0x677   : > { %v1904_v50 = vadd.f32 %v1888_v17, %v1872_v42 }
 0x678   : > { %v1821_v28 = vpop.permute.xlu1 %1820 }
 0x679   : > { %v1921_v18 = vsel %vm1914_vm3, %v1904_v50, 0.0  ;;  %v1859_v15 = vadd.f32 %v1821_v28, %v1699_v45 }
 0x67a   : > { %1937 = vst [vmem:[%s3343_s14 + $0x30] sm:$0xff] %v1921_v18 }
 0x67b   : > { %v1891_v0 = vmul.f32 0.5, %v1859_v15 }
 0x67c   : > { %v1665_v12 = vpop.permute.xlu1 %1664 }
 0x67d   : > { %v1907_v44 = vadd.f32 %v1891_v0, %v1875_v26  ;;  %v1701_v23 = vadd.f32 %v1665_v12, %v1541_v9  ;;  %v1880_v0 = vmul.f32 0.5, %v2947_v58 }
 0x67f   : > { %v1924_v60 = vsel %vm1914_vm3, %v1907_v44, 0.0 }
 0x680   : > { %1940 = vst [vmem:[%s3343_s14 + $0x48] sm:$0xff] %v1924_v60 }
 0x682   : > { %v1659_v61 = vpop.permute.xlu0 %1658 }
 0x683   : > { %v1698_v2 = vadd.f32 %v1659_v61, %v1538_v33 }
 0x686   : > { %v1819_v47 = vpop.permute.xlu0 %1818 }
 0x687   : > { %v1858_v49 = vadd.f32 %v1819_v47, %v1698_v2 }
 0x689   : > { %v1890_v4 = vmul.f32 0.5, %v1858_v49 }
 0x68b   : > { %v1906_v30 = vadd.f32 %v1890_v4, %v1874_v62 }
 0x68c   : > { %v1825_v52 = vpop.permute.xlu1 %1824 }
 0x68d   : > { %v1923_v48 = vsel %vm1914_vm3, %v1906_v30, 0.0  ;;  %v1861_v31 = vadd.f32 %v1825_v52, %v1701_v23 }
 0x68e   : > { %1939 = vst [vmem:[%s3343_s14 + $0x40] sm:$0xff] %v1923_v48 }
 0x68f   : > { %v1893_v51 = vmul.f32 0.5, %v1861_v31 }
 0x690   : > { %v1669_v19 = vpop.permute.xlu1 %1668 }
 0x691   : > { %v1909_v57 = vadd.f32 %v1893_v51, %v1877_v32  ;;  %v1663_v10 = vpop.permute.xlu0 %1662  ;;  %v1703_v20 = vadd.f32 %v1669_v19, %v1543_v24 }
 0x692   : > { %v1700_v35 = vadd.f32 %v1663_v10, %v1540_v5 }
 0x693   : > { %v1926_v13 = vsel %vm1914_vm3, %v1909_v57, 0.0 }
 0x694   : > { %1942 = vst [vmem:[%s3343_s14 + $0x58] sm:$0xff] %v1926_v13 }
 0x695   : > { %v1823_v25 = vpop.permute.xlu0 %1822 }
 0x696   : > { %v1860_v22 = vadd.f32 %v1823_v25, %v1700_v35 }
 0x698   : > { %v1892_v14 = vmul.f32 0.5, %v1860_v22 }
 0x69a   : > { %v1908_v7 = vadd.f32 %v1892_v14, %v1876_v11 }
 0x69b   : > { %v1829_v6 = vpop.permute.xlu1 %1828 }
 0x69c   : > { %v1925_v41 = vsel %vm1914_vm3, %v1908_v7, 0.0  ;;  %v1863_v34 = vadd.f32 %v1829_v6, %v1703_v20 }
 0x69d   : > { %1941 = vst [vmem:[%s3343_s14 + $0x50] sm:$0xff] %v1925_v41 }
 0x69e   : > { %v1895_v53 = vmul.f32 0.5, %v1863_v34 }
 0x69f   : > { %v1673_v45 = vpop.permute.xlu1 %1672 }
 0x6a0   : > { %v1911_v29 = vadd.f32 %v1895_v53, %v1879_v8  ;;  %v1667_v63 = vpop.permute.xlu0 %1666  ;;  %v1705_v28 = vadd.f32 %v1673_v45, %v1545_v36 }
 0x6a1   : > { %v1702_v37 = vadd.f32 %v1667_v63, %v1542_v16 }
 0x6a2   : > { %v1928_v27 = vsel %vm1914_vm3, %v1911_v29, 0.0 }
 0x6a3   : > { %1944 = vst [vmem:[%s3343_s14 + $0x68] sm:$0xff] %v1928_v27 }
 0x6a4   : > { %v1827_v54 = vpop.permute.xlu0 %1826 }
 0x6a5   : > { %v1862_v21 = vadd.f32 %v1827_v54, %v1702_v37 }
 0x6a7   : > { %v1894_v42 = vmul.f32 0.5, %v1862_v21 }
 0x6a9   : > { %v1910_v1 = vadd.f32 %v1894_v42, %v1878_v43 }
 0x6aa   : > { %v1671_v17 = vpop.permute.xlu0 %1670 }
 0x6ab   : > { %v1927_v50 = vsel %vm1914_vm3, %v1910_v1, 0.0  ;;  %v1704_v55 = vadd.f32 %v1671_v17, %v1544_v46 }
 0x6ac   : > { %1943 = vst [vmem:[%s3343_s14 + $0x60] sm:$0xff] %v1927_v50 }
 0x6ae   : > { %v1831_v18 = vpop.permute.xlu0 %1830 }
 0x6af   : > { %v1864_v15 = vadd.f32 %v1831_v18, %v1704_v55  ;;  %v1833_v40 = vpop.permute.xlu1 %1832 }
 0x6b0   : > { %v1865_v26 = vadd.f32 %v1833_v40, %v1705_v28 }
 0x6b1   : > { %v1896_v44 = vmul.f32 0.5, %v1864_v15 }
 0x6b2   : > { %v1897_v56 = vmul.f32 0.5, %v1865_v26 }
 0x6b3   : > { %v1912_v60 = vadd.f32 %v1896_v44, %v1880_v0 }
 0x6b4   : > { %v1913_v61 = vadd.f32 %v1897_v56, %v1881_v38 }
 0x6b5   : > { %v1929_v33 = vsel %vm1914_vm3, %v1912_v60, 0.0 }
 0x6b6   : > { %1945 = vst [vmem:[%s3343_s14 + $0x70] sm:$0xff] %v1929_v33  ;;  %v1930_v39 = vsel %vm1914_vm3, %v1913_v61, 0.0 }
 0x6b7   : > { %1946 = vst [vmem:[%s3343_s14 + $0x78] sm:$0xff] %v1930_v39 }
 0x6b8 PF: > { %s16_s21 = sadd.s32 1, %s2473_s21  }
 0x6b9   : > { %p13_p4 = scmp.ge.s32.totalorder %s16_s21, 4  }
 0x6bb   :  { %15 = sbr.rel (!%p13_p4) target bundleno = 1 (0x1), region = 75 }

</bundles_post_ra>
